<compile_context>
chip_gen: v5e
topology: v5e:2x2
jax: 0.10.0
libtpu: 0.0.40
codegen_flags: <defaults>
</compile_context>

<pallas_src>
import functools

import jax
import jax.numpy as jnp
import numpy as np
from jax.experimental import pallas as pl
from jax.experimental.pallas import tpu as pltpu


def _layernorm(x, gamma, beta, eps=1e-6):
    mu = jnp.mean(x, axis=-1, keepdims=True)
    var = jnp.mean((x - mu) ** 2, axis=-1, keepdims=True)
    return (x - mu) * jax.lax.rsqrt(var + eps) * gamma + beta


def mpnn_kernel(hV_ref, hE_ref, mA_ref, mV_ref,
                w1v_ref, w1e_ref, b1_ref,
                w2_ref, b2_ref,
                w3_ref, b3_ref,
                eexp_ref,
                g0_ref, be0_ref,
                win_ref, bin_ref,
                wout_ref, bout_ref,
                g1_ref, be1_ref,
                out_ref, *, inv_scale):
    f32 = jnp.float32
    bf16 = jnp.bfloat16

    hV_bf = hV_ref[...]                      # (tm, H)    bf16
    hV = hV_bf.astype(f32)
    hE = hE_ref[...]                         # (tm, K*C)  bf16, lane-dense
    mA = mA_ref[...]                         # (tm, K)    bf16, {0,1}
    mV = mV_ref[...]                         # (tm, 1)    f32

    # ---- message MLP: lane-dense block-diagonal matmuls over all K neighbors ----
    # h1[:, k*H+j] == relu( hV @ w1v + hE[:,k*C:(k+1)*C] @ w1e + b1 )[:, j]
    h1 = jax.nn.relu(
        jnp.dot(hV_bf, w1v_ref[...], preferred_element_type=f32)
        + jnp.dot(hE, w1e_ref[...], preferred_element_type=f32)
        + b1_ref[...])                                                   # (tm, K*H) f32
    h2 = jax.nn.relu(
        jnp.dot(h1.astype(bf16), w2_ref[...], preferred_element_type=f32)
        + b2_ref[...])                                                   # (tm, K*H) f32

    # attention mask + 1/scale, expanded to (tm, K*H) via a tiny MXU matmul
    factor = jnp.dot(mA, eexp_ref[...], preferred_element_type=f32) * inv_scale
    fsum = jnp.sum(mA.astype(f32), axis=-1, keepdims=True) * inv_scale   # (tm, 1)

    # masked K-sum folded into the W3 contraction (W3 is K-stacked (K*H, H))
    dh = (jnp.dot((h2 * factor).astype(bf16), w3_ref[...],
                  preferred_element_type=f32)
          + fsum * b3_ref[...])                                          # (tm, H) f32

    # ---- residual + LayerNorm 0  (dropout == identity in eval mode) ----
    x = _layernorm(hV + dh, g0_ref[...], be0_ref[...])

    # ---- position-wise feed-forward ----
    f = jax.nn.relu(jnp.dot(x.astype(bf16), win_ref[...],
                            preferred_element_type=f32) + bin_ref[...])
    f = jnp.dot(f.astype(bf16), wout_ref[...],
                preferred_element_type=f32) + bout_ref[...]

    # ---- residual + LayerNorm 1, node mask ----
    y = _layernorm(x + f, g1_ref[...], be1_ref[...])
    out_ref[...] = (mV * y).astype(out_ref.dtype)


def _round_up(a, b):
    return (a + b - 1) // b * b


def _cdiv(a, b):
    return (a + b - 1) // b


def _block_diag(mat, k):
    r, c = mat.shape
    out = jnp.zeros((k * r, k * c), mat.dtype)
    for i in range(k):
        out = out.at[i * r:(i + 1) * r, i * c:(i + 1) * c].set(mat)
    return out


def prepare_kernel_params(raw, K, compute_dtype=jnp.bfloat16):
    """Repack the PyTorch-layout parameters into lane-dense kernel layout."""
    (W1, b1, W2, b2, W3, b3, g0, be0, Win, bin_, Wout, bout, g1, be1) = raw
    H = W1.shape[0]
    f32 = jnp.float32
    w1 = W1.T                                  # (H+C, H), x @ W layout
    w1v, w1e = w1[:H], w1[H:]

    return (
        jnp.tile(w1v, (1, K)).astype(compute_dtype),                      # (H,   K*H)
        _block_diag(w1e, K).astype(compute_dtype),                        # (K*C, K*H)
        jnp.tile(b1, (K,)).reshape(1, K * H).astype(f32),                 # (1,   K*H)
        _block_diag(W2.T, K).astype(compute_dtype),                       # (K*H, K*H)
        jnp.tile(b2, (K,)).reshape(1, K * H).astype(f32),                 # (1,   K*H)
        jnp.concatenate([W3.T] * K, axis=0).astype(compute_dtype),        # (K*H, H)
        b3.reshape(1, H).astype(f32),                                     # (1,   H)
        jnp.repeat(jnp.eye(K, dtype=f32), H, axis=1).astype(compute_dtype),  # (K, K*H)
        g0.reshape(1, H).astype(f32), be0.reshape(1, H).astype(f32),
        Win.T.astype(compute_dtype), bin_.reshape(1, -1).astype(f32),
        Wout.T.astype(compute_dtype), bout.reshape(1, H).astype(f32),
        g1.reshape(1, H).astype(f32), be1.reshape(1, H).astype(f32),
    )


def mpnn_layer(h_V, h_E, mask_V, mask_attend, raw_params, *,
               scale=30, tm=2048, vmem_limit_bytes=48 * 1024 * 1024):
    """h_V: (N,L,H)  h_E: (N,L,K,C)  mask_V: (N,L)  mask_attend: (N,L,K)."""
    N, L, H = h_V.shape
    K, C = h_E.shape[-2], h_E.shape[-1]
    R = N * L
    bf16 = jnp.bfloat16

    # Balanced tile size: multiple of 8 sublanes, clamped for small inputs.
    n_tiles = max(1, _cdiv(R, tm))
    tm_eff = _round_up(_cdiv(R, n_tiles), 8)
    R_pad = _round_up(R, tm_eff)
    pad = R_pad - R

    # bf16 matmul operands in HBM (h_E dominates traffic); masks {0,1} are exact.
    hV2 = h_V.reshape(R, H).astype(bf16)
    hE2 = h_E.reshape(R, K * C).astype(bf16)           # lane-dense 512-wide slab
    mA2 = mask_attend.reshape(R, K).astype(bf16)
    mV2 = mask_V.reshape(R, 1).astype(jnp.float32)
    if pad:
        # Padded rows are fully masked and sliced off below.
        hV2 = jnp.pad(hV2, ((0, pad), (0, 0)))
        hE2 = jnp.pad(hE2, ((0, pad), (0, 0)))
        mA2 = jnp.pad(mA2, ((0, pad), (0, 0)))
        mV2 = jnp.pad(mV2, ((0, pad), (0, 0)))

    kparams = prepare_kernel_params(raw_params, K)

    # Weights: whole array resident every step (constant block index).
    weight_specs = [pl.BlockSpec(p.shape, lambda i: (0, 0)) for p in kparams]

    grid = (R_pad // tm_eff,)
    out = pl.pallas_call(
        functools.partial(mpnn_kernel, inv_scale=1.0 / float(scale)),
        out_shape=jax.ShapeDtypeStruct((R_pad, H), h_V.dtype),
        grid_spec=pltpu.PrefetchScalarGridSpec(
            num_scalar_prefetch=0,
            grid=grid,
            in_specs=[
                pl.BlockSpec((tm_eff, H), lambda i: (i, 0)),
                pl.BlockSpec((tm_eff, K * C), lambda i: (i, 0)),
                pl.BlockSpec((tm_eff, K), lambda i: (i, 0)),
                pl.BlockSpec((tm_eff, 1), lambda i: (i, 0)),
            ] + weight_specs,
            out_specs=pl.BlockSpec((tm_eff, H), lambda i: (i, 0)),
        ),
        compiler_params=pltpu.CompilerParams(
            dimension_semantics=("parallel",),
            vmem_limit_bytes=vmem_limit_bytes),
    )(hV2, hE2, mA2, mV2, *kparams)
    return out[:R].reshape(N, L, H)


# ---------------------------------------------------------------------------
# Pure-JAX f32 reference (mirrors the PyTorch module) + test harness
# ---------------------------------------------------------------------------
def reference_mpnn(h_V, h_E, mask_V, mask_attend, raw, scale=30):
    (W1, b1, W2, b2, W3, b3, g0, be0, Win, bin_, Wout, bout, g1, be1) = raw
    K = h_E.shape[-2]
    hv_exp = jnp.broadcast_to(h_V[..., None, :],
                              h_V.shape[:-1] + (K, h_V.shape[-1]))
    h_EV = jnp.concatenate([hv_exp, h_E], axis=-1)
    h = jax.nn.relu(h_EV @ W1.T + b1)
    h = jax.nn.relu(h @ W2.T + b2)
    msg = h @ W3.T + b3
    msg = mask_attend[..., None] * msg
    dh = jnp.sum(msg, axis=-2) / scale
    x = _layernorm(h_V + dh, g0, be0)
    f = jax.nn.relu(x @ Win.T + bin_)
    f = f @ Wout.T + bout
    y = _layernorm(x + f, g1, be1)
    return mask_V[..., None] * y


def _make_params(key, H, C):
    ks = jax.random.split(key, 10)

    def lin(kw, kb, out_dim, in_dim):
        bound = 1.0 / np.sqrt(in_dim)
        W = jax.random.uniform(kw, (out_dim, in_dim), jnp.float32, -bound, bound)
        b = jax.random.uniform(kb, (out_dim,), jnp.float32, -bound, bound)
        return W, b

    W1, b1 = lin(ks[0], ks[1], H, H + C)
    W2, b2 = lin(ks[2], ks[3], H, H)
    W3, b3 = lin(ks[4], ks[5], H, H)
    g0, be0 = jnp.ones((H,), jnp.float32), jnp.zeros((H,), jnp.float32)
    Win, bin_ = lin(ks[6], ks[7], 4 * H, H)
    Wout, bout = lin(ks[8], ks[9], H, 4 * H)
    g1, be1 = jnp.ones((H,), jnp.float32), jnp.zeros((H,), jnp.float32)
    return (W1, b1, W2, b2, W3, b3, g0, be0, Win, bin_, Wout, bout, g1, be1)


def _make_inputs(key, N, L, K, H, C):
    ks = jax.random.split(key, 4)
    h_V = jax.random.normal(ks[0], (N, L, H), jnp.float32)
    h_E = jax.random.normal(ks[1], (N, L, K, C), jnp.float32)
    mask_V = (jax.random.uniform(ks[2], (N, L)) > 0.2).astype(jnp.float32)
    mask_attend = (jax.random.uniform(ks[3], (N, L, K)) > 0.2).astype(jnp.float32)
    return h_V, h_E, mask_V, mask_attend


if __name__ == "__main__":
    H, C, K = 32, 64, 8          # num_hidden=32, num_in=64, K neighbors
    scale = 30

    key = jax.random.PRNGKey(0)
    k_par, k_in1, k_in2 = jax.random.split(key, 3)
    raw = _make_params(k_par, H, C)

    # bf16 matmul operands -> loosened tolerances vs the f32 reference.
    RTOL, ATOL = 5e-2, 5e-2

    # Test 1: small shape, single tile (tm clamps to R=16).
    h_V, h_E, mask_V, mask_attend = _make_inputs(k_in1, 2, 8, K, H, C)
    out = mpnn_layer(h_V, h_E, mask_V, mask_attend, raw, scale=scale)
    out = jax.block_until_ready(out)
    ref = reference_mpnn(h_V, h_E, mask_V, mask_attend, raw, scale=scale)
    np.testing.assert_allclose(np.asarray(out), np.asarray(ref),
                               rtol=RTOL, atol=ATOL)

    # Test 2: multi-tile grid with a ragged R (R=144, tm=64 -> 3 balanced tiles).
    h_V, h_E, mask_V, mask_attend = _make_inputs(k_in2, 4, 36, K, H, C)
    out2 = mpnn_layer(h_V, h_E, mask_V, mask_attend, raw, scale=scale, tm=64)
    out2 = jax.block_until_ready(out2)
    ref2 = reference_mpnn(h_V, h_E, mask_V, mask_attend, raw, scale=scale)
    np.testing.assert_allclose(np.asarray(out2), np.asarray(ref2),
                               rtol=RTOL, atol=ATOL)

    print("KERNEL_OK")
</pallas_src>

<mosaic_0001>
module attributes {stable_mosaic.version = 11 : i64} {
  func.func @mpnn_kernel(%arg0: i32, %arg1: memref<16x32xbf16, #tpu.memory_space<vmem>>, %arg2: memref<16x512xbf16, #tpu.memory_space<vmem>>, %arg3: memref<16x8xbf16, #tpu.memory_space<vmem>>, %arg4: memref<16x1xf32, #tpu.memory_space<vmem>>, %arg5: memref<32x256xbf16, #tpu.memory_space<vmem>>, %arg6: memref<512x256xbf16, #tpu.memory_space<vmem>>, %arg7: memref<1x256xf32, #tpu.memory_space<vmem>>, %arg8: memref<256x256xbf16, #tpu.memory_space<vmem>>, %arg9: memref<1x256xf32, #tpu.memory_space<vmem>>, %arg10: memref<256x32xbf16, #tpu.memory_space<vmem>>, %arg11: memref<1x32xf32, #tpu.memory_space<vmem>>, %arg12: memref<8x256xbf16, #tpu.memory_space<vmem>>, %arg13: memref<1x32xf32, #tpu.memory_space<vmem>>, %arg14: memref<1x32xf32, #tpu.memory_space<vmem>>, %arg15: memref<32x128xbf16, #tpu.memory_space<vmem>>, %arg16: memref<1x128xf32, #tpu.memory_space<vmem>>, %arg17: memref<128x32xbf16, #tpu.memory_space<vmem>>, %arg18: memref<1x32xf32, #tpu.memory_space<vmem>>, %arg19: memref<1x32xf32, #tpu.memory_space<vmem>>, %arg20: memref<1x32xf32, #tpu.memory_space<vmem>>, %arg21: memref<16x32xf32, #tpu.memory_space<vmem>>) attributes {dimension_semantics = [#tpu.dimension_semantics<parallel>], iteration_bounds = array<i64: 1>, scalar_prefetch = 0 : i64, scratch_operands = 0 : i64, tpu.core_type = #tpu.core_type<tc>, window_params = [{transform_indices = @transform_0, window_bounds = array<i64: 16, 32>}, {transform_indices = @transform_1, window_bounds = array<i64: 16, 512>}, {transform_indices = @transform_2, window_bounds = array<i64: 16, 8>}, {transform_indices = @transform_3, window_bounds = array<i64: 16, 1>}, {pipeline_mode = #tpu.pipeline_mode<synchronous>, transform_indices = @transform_4, window_bounds = array<i64: 32, 256>}, {pipeline_mode = #tpu.pipeline_mode<synchronous>, transform_indices = @transform_5, window_bounds = array<i64: 512, 256>}, {pipeline_mode = #tpu.pipeline_mode<synchronous>, transform_indices = @transform_6, window_bounds = array<i64: 1, 256>}, {pipeline_mode = #tpu.pipeline_mode<synchronous>, transform_indices = @transform_7, window_bounds = array<i64: 256, 256>}, {pipeline_mode = #tpu.pipeline_mode<synchronous>, transform_indices = @transform_8, window_bounds = array<i64: 1, 256>}, {pipeline_mode = #tpu.pipeline_mode<synchronous>, transform_indices = @transform_9, window_bounds = array<i64: 256, 32>}, {pipeline_mode = #tpu.pipeline_mode<synchronous>, transform_indices = @transform_10, window_bounds = array<i64: 1, 32>}, {pipeline_mode = #tpu.pipeline_mode<synchronous>, transform_indices = @transform_11, window_bounds = array<i64: 8, 256>}, {pipeline_mode = #tpu.pipeline_mode<synchronous>, transform_indices = @transform_12, window_bounds = array<i64: 1, 32>}, {pipeline_mode = #tpu.pipeline_mode<synchronous>, transform_indices = @transform_13, window_bounds = array<i64: 1, 32>}, {pipeline_mode = #tpu.pipeline_mode<synchronous>, transform_indices = @transform_14, window_bounds = array<i64: 32, 128>}, {pipeline_mode = #tpu.pipeline_mode<synchronous>, transform_indices = @transform_15, window_bounds = array<i64: 1, 128>}, {pipeline_mode = #tpu.pipeline_mode<synchronous>, transform_indices = @transform_16, window_bounds = array<i64: 128, 32>}, {pipeline_mode = #tpu.pipeline_mode<synchronous>, transform_indices = @transform_17, window_bounds = array<i64: 1, 32>}, {pipeline_mode = #tpu.pipeline_mode<synchronous>, transform_indices = @transform_18, window_bounds = array<i64: 1, 32>}, {pipeline_mode = #tpu.pipeline_mode<synchronous>, transform_indices = @transform_19, window_bounds = array<i64: 1, 32>}, {transform_indices = @transform_20, window_bounds = array<i64: 16, 32>}]} {
    %c0 = arith.constant 0 : index
    %c0_0 = arith.constant 0 : index
    %0 = vector.load %arg1[%c0, %c0_0] : memref<16x32xbf16, #tpu.memory_space<vmem>>, vector<16x32xbf16>
    %1 = arith.extf %0 : vector<16x32xbf16> to vector<16x32xf32>
    %c0_1 = arith.constant 0 : index
    %c0_2 = arith.constant 0 : index
    %2 = vector.load %arg2[%c0_1, %c0_2] : memref<16x512xbf16, #tpu.memory_space<vmem>>, vector<16x512xbf16>
    %c0_3 = arith.constant 0 : index
    %c0_4 = arith.constant 0 : index
    %3 = vector.load %arg3[%c0_3, %c0_4] : memref<16x8xbf16, #tpu.memory_space<vmem>>, vector<16x8xbf16>
    %c0_5 = arith.constant 0 : index
    %c0_6 = arith.constant 0 : index
    %4 = vector.load %arg4[%c0_5, %c0_6] : memref<16x1xf32, #tpu.memory_space<vmem>>, vector<16x1xf32>
    %c0_7 = arith.constant 0 : index
    %c0_8 = arith.constant 0 : index
    %5 = vector.load %arg5[%c0_7, %c0_8] : memref<32x256xbf16, #tpu.memory_space<vmem>>, vector<32x256xbf16>
    %cst = arith.constant dense<0.000000e+00> : vector<16x256xf32>
    %6 = tpu.matmul %0, %5, %cst {dimension_numbers = #tpu.dot_dimension_numbers<[1], [0], [0], [1], [0, 0, 1, 1], [], []>} : vector<16x32xbf16>, vector<32x256xbf16>, vector<16x256xf32> -> vector<16x256xf32>
    %c0_9 = arith.constant 0 : index
    %c0_10 = arith.constant 0 : index
    %7 = vector.load %arg6[%c0_9, %c0_10] : memref<512x256xbf16, #tpu.memory_space<vmem>>, vector<512x256xbf16>
    %cst_11 = arith.constant dense<0.000000e+00> : vector<16x256xf32>
    %8 = tpu.matmul %2, %7, %cst_11 {dimension_numbers = #tpu.dot_dimension_numbers<[1], [0], [0], [1], [0, 0, 1, 1], [], []>} : vector<16x512xbf16>, vector<512x256xbf16>, vector<16x256xf32> -> vector<16x256xf32>
    %9 = arith.addf %6, %8 : vector<16x256xf32>
    %c0_12 = arith.constant 0 : index
    %c0_13 = arith.constant 0 : index
    %10 = vector.load %arg7[%c0_12, %c0_13] : memref<1x256xf32, #tpu.memory_space<vmem>>, vector<1x256xf32>
    %11 = vector.broadcast %10 : vector<1x256xf32> to vector<16x256xf32>
    %12 = arith.addf %9, %11 : vector<16x256xf32>
    %cst_14 = arith.constant 0.000000e+00 : f32
    %13 = vector.broadcast %cst_14 : f32 to vector<16x256xf32>
    %14 = arith.maximumf %12, %13 : vector<16x256xf32>
    %15 = arith.truncf %14 : vector<16x256xf32> to vector<16x256xbf16>
    %c0_15 = arith.constant 0 : index
    %c0_16 = arith.constant 0 : index
    %16 = vector.load %arg8[%c0_15, %c0_16] : memref<256x256xbf16, #tpu.memory_space<vmem>>, vector<256x256xbf16>
    %cst_17 = arith.constant dense<0.000000e+00> : vector<16x256xf32>
    %17 = tpu.matmul %15, %16, %cst_17 {dimension_numbers = #tpu.dot_dimension_numbers<[1], [0], [0], [1], [0, 0, 1, 1], [], []>} : vector<16x256xbf16>, vector<256x256xbf16>, vector<16x256xf32> -> vector<16x256xf32>
    %c0_18 = arith.constant 0 : index
    %c0_19 = arith.constant 0 : index
    %18 = vector.load %arg9[%c0_18, %c0_19] : memref<1x256xf32, #tpu.memory_space<vmem>>, vector<1x256xf32>
    %19 = vector.broadcast %18 : vector<1x256xf32> to vector<16x256xf32>
    %20 = arith.addf %17, %19 : vector<16x256xf32>
    %cst_20 = arith.constant 0.000000e+00 : f32
    %21 = vector.broadcast %cst_20 : f32 to vector<16x256xf32>
    %22 = arith.maximumf %20, %21 : vector<16x256xf32>
    %c0_21 = arith.constant 0 : index
    %c0_22 = arith.constant 0 : index
    %23 = vector.load %arg12[%c0_21, %c0_22] : memref<8x256xbf16, #tpu.memory_space<vmem>>, vector<8x256xbf16>
    %cst_23 = arith.constant dense<0.000000e+00> : vector<16x256xf32>
    %24 = tpu.matmul %3, %23, %cst_23 {dimension_numbers = #tpu.dot_dimension_numbers<[1], [0], [0], [1], [0, 0, 1, 1], [], []>} : vector<16x8xbf16>, vector<8x256xbf16>, vector<16x256xf32> -> vector<16x256xf32>
    %cst_24 = arith.constant 0.0333333351 : f32
    %25 = vector.broadcast %cst_24 : f32 to vector<16x256xf32>
    %26 = arith.mulf %24, %25 : vector<16x256xf32>
    %27 = arith.extf %3 : vector<16x8xbf16> to vector<16x8xf32>
    %cst_25 = arith.constant dense<0.000000e+00> : vector<16xf32>
    %28 = vector.multi_reduction <add>, %27, %cst_25 [1] : vector<16x8xf32> to vector<16xf32>
    %29 = vector.shape_cast %28 : vector<16xf32> to vector<16x1xf32>
    %cst_26 = arith.constant 0.0333333351 : f32
    %30 = vector.broadcast %cst_26 : f32 to vector<16x1xf32>
    %31 = arith.mulf %29, %30 : vector<16x1xf32>
    %32 = arith.mulf %22, %26 : vector<16x256xf32>
    %33 = arith.truncf %32 : vector<16x256xf32> to vector<16x256xbf16>
    %c0_27 = arith.constant 0 : index
    %c0_28 = arith.constant 0 : index
    %34 = vector.load %arg10[%c0_27, %c0_28] : memref<256x32xbf16, #tpu.memory_space<vmem>>, vector<256x32xbf16>
    %cst_29 = arith.constant dense<0.000000e+00> : vector<16x32xf32>
    %35 = tpu.matmul %33, %34, %cst_29 {dimension_numbers = #tpu.dot_dimension_numbers<[1], [0], [0], [1], [0, 0, 1, 1], [], []>} : vector<16x256xbf16>, vector<256x32xbf16>, vector<16x32xf32> -> vector<16x32xf32>
    %c0_30 = arith.constant 0 : index
    %c0_31 = arith.constant 0 : index
    %36 = vector.load %arg11[%c0_30, %c0_31] : memref<1x32xf32, #tpu.memory_space<vmem>>, vector<1x32xf32>
    %37 = vector.broadcast %31 : vector<16x1xf32> to vector<16x32xf32>
    %38 = vector.broadcast %36 : vector<1x32xf32> to vector<16x32xf32>
    %39 = arith.mulf %37, %38 : vector<16x32xf32>
    %40 = arith.addf %35, %39 : vector<16x32xf32>
    %41 = arith.addf %1, %40 : vector<16x32xf32>
    %c0_32 = arith.constant 0 : index
    %c0_33 = arith.constant 0 : index
    %42 = vector.load %arg13[%c0_32, %c0_33] : memref<1x32xf32, #tpu.memory_space<vmem>>, vector<1x32xf32>
    %c0_34 = arith.constant 0 : index
    %c0_35 = arith.constant 0 : index
    %43 = vector.load %arg14[%c0_34, %c0_35] : memref<1x32xf32, #tpu.memory_space<vmem>>, vector<1x32xf32>
    %cst_36 = arith.constant dense<0.000000e+00> : vector<16xf32>
    %44 = vector.multi_reduction <add>, %41, %cst_36 [1] : vector<16x32xf32> to vector<16xf32>
    %45 = vector.shape_cast %44 : vector<16xf32> to vector<16x1xf32>
    %cst_37 = arith.constant 3.200000e+01 : f32
    %46 = vector.broadcast %cst_37 : f32 to vector<16x1xf32>
    %47 = arith.divf %45, %46 : vector<16x1xf32>
    %48 = vector.broadcast %47 : vector<16x1xf32> to vector<16x32xf32>
    %49 = arith.subf %41, %48 : vector<16x32xf32>
    %50 = arith.mulf %49, %49 : vector<16x32xf32>
    %cst_38 = arith.constant dense<0.000000e+00> : vector<16xf32>
    %51 = vector.multi_reduction <add>, %50, %cst_38 [1] : vector<16x32xf32> to vector<16xf32>
    %52 = vector.shape_cast %51 : vector<16xf32> to vector<16x1xf32>
    %cst_39 = arith.constant 3.200000e+01 : f32
    %53 = vector.broadcast %cst_39 : f32 to vector<16x1xf32>
    %54 = arith.divf %52, %53 : vector<16x1xf32>
    %55 = vector.broadcast %47 : vector<16x1xf32> to vector<16x32xf32>
    %56 = arith.subf %41, %55 : vector<16x32xf32>
    %cst_40 = arith.constant 9.99999997E-7 : f32
    %57 = vector.broadcast %cst_40 : f32 to vector<16x1xf32>
    %58 = arith.addf %54, %57 : vector<16x1xf32>
    %59 = math.rsqrt %58 : vector<16x1xf32>
    %60 = vector.broadcast %59 : vector<16x1xf32> to vector<16x32xf32>
    %61 = arith.mulf %56, %60 : vector<16x32xf32>
    %62 = vector.broadcast %42 : vector<1x32xf32> to vector<16x32xf32>
    %63 = arith.mulf %61, %62 : vector<16x32xf32>
    %64 = vector.broadcast %43 : vector<1x32xf32> to vector<16x32xf32>
    %65 = arith.addf %63, %64 : vector<16x32xf32>
    %66 = arith.truncf %65 : vector<16x32xf32> to vector<16x32xbf16>
    %c0_41 = arith.constant 0 : index
    %c0_42 = arith.constant 0 : index
    %67 = vector.load %arg15[%c0_41, %c0_42] : memref<32x128xbf16, #tpu.memory_space<vmem>>, vector<32x128xbf16>
    %cst_43 = arith.constant dense<0.000000e+00> : vector<16x128xf32>
    %68 = tpu.matmul %66, %67, %cst_43 {dimension_numbers = #tpu.dot_dimension_numbers<[1], [0], [0], [1], [0, 0, 1, 1], [], []>} : vector<16x32xbf16>, vector<32x128xbf16>, vector<16x128xf32> -> vector<16x128xf32>
    %c0_44 = arith.constant 0 : index
    %c0_45 = arith.constant 0 : index
    %69 = vector.load %arg16[%c0_44, %c0_45] : memref<1x128xf32, #tpu.memory_space<vmem>>, vector<1x128xf32>
    %70 = vector.broadcast %69 : vector<1x128xf32> to vector<16x128xf32>
    %71 = arith.addf %68, %70 : vector<16x128xf32>
    %cst_46 = arith.constant 0.000000e+00 : f32
    %72 = vector.broadcast %cst_46 : f32 to vector<16x128xf32>
    %73 = arith.maximumf %71, %72 : vector<16x128xf32>
    %74 = arith.truncf %73 : vector<16x128xf32> to vector<16x128xbf16>
    %c0_47 = arith.constant 0 : index
    %c0_48 = arith.constant 0 : index
    %75 = vector.load %arg17[%c0_47, %c0_48] : memref<128x32xbf16, #tpu.memory_space<vmem>>, vector<128x32xbf16>
    %cst_49 = arith.constant dense<0.000000e+00> : vector<16x32xf32>
    %76 = tpu.matmul %74, %75, %cst_49 {dimension_numbers = #tpu.dot_dimension_numbers<[1], [0], [0], [1], [0, 0, 1, 1], [], []>} : vector<16x128xbf16>, vector<128x32xbf16>, vector<16x32xf32> -> vector<16x32xf32>
    %c0_50 = arith.constant 0 : index
    %c0_51 = arith.constant 0 : index
    %77 = vector.load %arg18[%c0_50, %c0_51] : memref<1x32xf32, #tpu.memory_space<vmem>>, vector<1x32xf32>
    %78 = vector.broadcast %77 : vector<1x32xf32> to vector<16x32xf32>
    %79 = arith.addf %76, %78 : vector<16x32xf32>
    %80 = arith.addf %65, %79 : vector<16x32xf32>
    %c0_52 = arith.constant 0 : index
    %c0_53 = arith.constant 0 : index
    %81 = vector.load %arg19[%c0_52, %c0_53] : memref<1x32xf32, #tpu.memory_space<vmem>>, vector<1x32xf32>
    %c0_54 = arith.constant 0 : index
    %c0_55 = arith.constant 0 : index
    %82 = vector.load %arg20[%c0_54, %c0_55] : memref<1x32xf32, #tpu.memory_space<vmem>>, vector<1x32xf32>
    %cst_56 = arith.constant dense<0.000000e+00> : vector<16xf32>
    %83 = vector.multi_reduction <add>, %80, %cst_56 [1] : vector<16x32xf32> to vector<16xf32>
    %84 = vector.shape_cast %83 : vector<16xf32> to vector<16x1xf32>
    %cst_57 = arith.constant 3.200000e+01 : f32
    %85 = vector.broadcast %cst_57 : f32 to vector<16x1xf32>
    %86 = arith.divf %84, %85 : vector<16x1xf32>
    %87 = vector.broadcast %86 : vector<16x1xf32> to vector<16x32xf32>
    %88 = arith.subf %80, %87 : vector<16x32xf32>
    %89 = arith.mulf %88, %88 : vector<16x32xf32>
    %cst_58 = arith.constant dense<0.000000e+00> : vector<16xf32>
    %90 = vector.multi_reduction <add>, %89, %cst_58 [1] : vector<16x32xf32> to vector<16xf32>
    %91 = vector.shape_cast %90 : vector<16xf32> to vector<16x1xf32>
    %cst_59 = arith.constant 3.200000e+01 : f32
    %92 = vector.broadcast %cst_59 : f32 to vector<16x1xf32>
    %93 = arith.divf %91, %92 : vector<16x1xf32>
    %94 = vector.broadcast %86 : vector<16x1xf32> to vector<16x32xf32>
    %95 = arith.subf %80, %94 : vector<16x32xf32>
    %cst_60 = arith.constant 9.99999997E-7 : f32
    %96 = vector.broadcast %cst_60 : f32 to vector<16x1xf32>
    %97 = arith.addf %93, %96 : vector<16x1xf32>
    %98 = math.rsqrt %97 : vector<16x1xf32>
    %99 = vector.broadcast %98 : vector<16x1xf32> to vector<16x32xf32>
    %100 = arith.mulf %95, %99 : vector<16x32xf32>
    %101 = vector.broadcast %81 : vector<1x32xf32> to vector<16x32xf32>
    %102 = arith.mulf %100, %101 : vector<16x32xf32>
    %103 = vector.broadcast %82 : vector<1x32xf32> to vector<16x32xf32>
    %104 = arith.addf %102, %103 : vector<16x32xf32>
    %105 = vector.broadcast %4 : vector<16x1xf32> to vector<16x32xf32>
    %106 = arith.mulf %105, %104 : vector<16x32xf32>
    %c0_61 = arith.constant 0 : index
    %c0_62 = arith.constant 0 : index
    %107 = vector.load %arg21[%c0_61, %c0_62] : memref<16x32xf32, #tpu.memory_space<vmem>>, vector<16x32xf32>
    tpu.vector_store %arg21[%c0_61, %c0_62], %106 {strides = array<i32>} : memref<16x32xf32, #tpu.memory_space<vmem>>, vector<16x32xf32>,
    return
  }
  func.func @transform_0(%arg0: i32) -> (i32, i32) {
    %c0_i32 = arith.constant 0 : i32
    %c0_i32_0 = arith.constant 0 : i32
    return %arg0, %c0_i32 : i32, i32
  }
  func.func @transform_1(%arg0: i32) -> (i32, i32) {
    %c0_i32 = arith.constant 0 : i32
    %c0_i32_0 = arith.constant 0 : i32
    return %arg0, %c0_i32 : i32, i32
  }
  func.func @transform_2(%arg0: i32) -> (i32, i32) {
    %c0_i32 = arith.constant 0 : i32
    %c0_i32_0 = arith.constant 0 : i32
    return %arg0, %c0_i32 : i32, i32
  }
  func.func @transform_3(%arg0: i32) -> (i32, i32) {
    %c0_i32 = arith.constant 0 : i32
    %c0_i32_0 = arith.constant 0 : i32
    return %arg0, %c0_i32 : i32, i32
  }
  func.func @transform_4(%arg0: i32) -> (i32, i32) {
    %c0_i32 = arith.constant 0 : i32
    %c0_i32_0 = arith.constant 0 : i32
    %c0_i32_1 = arith.constant 0 : i32
    return %c0_i32, %c0_i32_0 : i32, i32
  }
  func.func @transform_5(%arg0: i32) -> (i32, i32) {
    %c0_i32 = arith.constant 0 : i32
    %c0_i32_0 = arith.constant 0 : i32
    %c0_i32_1 = arith.constant 0 : i32
    return %c0_i32, %c0_i32_0 : i32, i32
  }
  func.func @transform_6(%arg0: i32) -> (i32, i32) {
    %c0_i32 = arith.constant 0 : i32
    %c0_i32_0 = arith.constant 0 : i32
    %c0_i32_1 = arith.constant 0 : i32
    return %c0_i32, %c0_i32_0 : i32, i32
  }
  func.func @transform_7(%arg0: i32) -> (i32, i32) {
    %c0_i32 = arith.constant 0 : i32
    %c0_i32_0 = arith.constant 0 : i32
    %c0_i32_1 = arith.constant 0 : i32
    return %c0_i32, %c0_i32_0 : i32, i32
  }
  func.func @transform_8(%arg0: i32) -> (i32, i32) {
    %c0_i32 = arith.constant 0 : i32
    %c0_i32_0 = arith.constant 0 : i32
    %c0_i32_1 = arith.constant 0 : i32
    return %c0_i32, %c0_i32_0 : i32, i32
  }
  func.func @transform_9(%arg0: i32) -> (i32, i32) {
    %c0_i32 = arith.constant 0 : i32
    %c0_i32_0 = arith.constant 0 : i32
    %c0_i32_1 = arith.constant 0 : i32
    return %c0_i32, %c0_i32_0 : i32, i32
  }
  func.func @transform_10(%arg0: i32) -> (i32, i32) {
    %c0_i32 = arith.constant 0 : i32
    %c0_i32_0 = arith.constant 0 : i32
    %c0_i32_1 = arith.constant 0 : i32
    return %c0_i32, %c0_i32_0 : i32, i32
  }
  func.func @transform_11(%arg0: i32) -> (i32, i32) {
    %c0_i32 = arith.constant 0 : i32
    %c0_i32_0 = arith.constant 0 : i32
    %c0_i32_1 = arith.constant 0 : i32
    return %c0_i32, %c0_i32_0 : i32, i32
  }
  func.func @transform_12(%arg0: i32) -> (i32, i32) {
    %c0_i32 = arith.constant 0 : i32
    %c0_i32_0 = arith.constant 0 : i32
    %c0_i32_1 = arith.constant 0 : i32
    return %c0_i32, %c0_i32_0 : i32, i32
  }
  func.func @transform_13(%arg0: i32) -> (i32, i32) {
    %c0_i32 = arith.constant 0 : i32
    %c0_i32_0 = arith.constant 0 : i32
    %c0_i32_1 = arith.constant 0 : i32
    return %c0_i32, %c0_i32_0 : i32, i32
  }
  func.func @transform_14(%arg0: i32) -> (i32, i32) {
    %c0_i32 = arith.constant 0 : i32
    %c0_i32_0 = arith.constant 0 : i32
    %c0_i32_1 = arith.constant 0 : i32
    return %c0_i32, %c0_i32_0 : i32, i32
  }
  func.func @transform_15(%arg0: i32) -> (i32, i32) {
    %c0_i32 = arith.constant 0 : i32
    %c0_i32_0 = arith.constant 0 : i32
    %c0_i32_1 = arith.constant 0 : i32
    return %c0_i32, %c0_i32_0 : i32, i32
  }
  func.func @transform_16(%arg0: i32) -> (i32, i32) {
    %c0_i32 = arith.constant 0 : i32
    %c0_i32_0 = arith.constant 0 : i32
    %c0_i32_1 = arith.constant 0 : i32
    return %c0_i32, %c0_i32_0 : i32, i32
  }
  func.func @transform_17(%arg0: i32) -> (i32, i32) {
    %c0_i32 = arith.constant 0 : i32
    %c0_i32_0 = arith.constant 0 : i32
    %c0_i32_1 = arith.constant 0 : i32
    return %c0_i32, %c0_i32_0 : i32, i32
  }
  func.func @transform_18(%arg0: i32) -> (i32, i32) {
    %c0_i32 = arith.constant 0 : i32
    %c0_i32_0 = arith.constant 0 : i32
    %c0_i32_1 = arith.constant 0 : i32
    return %c0_i32, %c0_i32_0 : i32, i32
  }
  func.func @transform_19(%arg0: i32) -> (i32, i32) {
    %c0_i32 = arith.constant 0 : i32
    %c0_i32_0 = arith.constant 0 : i32
    %c0_i32_1 = arith.constant 0 : i32
    return %c0_i32, %c0_i32_0 : i32, i32
  }
  func.func @transform_20(%arg0: i32) -> (i32, i32) {
    %c0_i32 = arith.constant 0 : i32
    %c0_i32_0 = arith.constant 0 : i32
    return %arg0, %c0_i32 : i32, i32
  }
}

</mosaic_0001>

<bundles_post_ra>
// kernel: tpu_custom_call.1
= control target key start
LH: loop header
LB: loop body
LE: loop exit
PB: predicated region body
PF: predicated region fallthrough
CT: control target
= control target key end

     0   :  { %s2603_s0 = inlined_call_operand.vmem [shape: bf16[16,32], index: 0, kind: input, shape index: {}]   ;;  %s2604_s1 = inlined_call_operand.vmem [shape: bf16[16,512], index: 1, kind: input, shape index: {}]   ;;  %s2605_s2 = inlined_call_operand.vmem [shape: bf16[16,8], index: 2, kind: input, shape index: {}]   ;;  %s2606_s3 = inlined_call_operand.vmem [shape: f32[16,1], index: 3, kind: input, shape index: {}]   ;;  %s2607_s4 = inlined_call_operand.vmem [shape: bf16[32,256], index: 4, kind: input, shape index: {}]   ;;  %s2608_s5 = inlined_call_operand.hbm [shape: bf16[512,256], index: 5, kind: input, shape index: {}]   ;;  %s2609_s6 = inlined_call_operand.vmem [shape: f32[1,256], index: 6, kind: input, shape index: {}]   ;;  %s2610_s7 = inlined_call_operand.hbm [shape: bf16[256,256], index: 7, kind: input, shape index: {}]   ;;  %s2611_s8 = inlined_call_operand.vmem [shape: f32[1,256], index: 8, kind: input, shape index: {}]   ;;  %s2612_s9 = inlined_call_operand.vmem [shape: bf16[256,32], index: 9, kind: input, shape index: {}]   ;;  %s2613_s10 = inlined_call_operand.vmem [shape: f32[1,32], index: 10, kind: input, shape index: {}]   ;;  %s2614_s11 = inlined_call_operand.vmem [shape: bf16[8,256], index: 11, kind: input, shape index: {}]   ;;  %s2615_s12 = inlined_call_operand.vmem [shape: f32[1,32], index: 12, kind: input, shape index: {}]   ;;  %s2616_s13 = inlined_call_operand.vmem [shape: f32[1,32], index: 13, kind: input, shape index: {}]   ;;  %s2617_s14 = inlined_call_operand.vmem [shape: bf16[32,128], index: 14, kind: input, shape index: {}]   ;;  %s2618_s15 = inlined_call_operand.vmem [shape: f32[1,128], index: 15, kind: input, shape index: {}]   ;;  %s2619_s16 = inlined_call_operand.vmem [shape: bf16[128,32], index: 16, kind: input, shape index: {}]   ;;  %s2620_s17 = inlined_call_operand.vmem [shape: f32[1,32], index: 17, kind: input, shape index: {}]   ;;  %s2621_s18 = inlined_call_operand.vmem [shape: f32[1,32], index: 18, kind: input, shape index: {}]   ;;  %s2622_s19 = inlined_call_operand.vmem [shape: f32[1,32], index: 19, kind: input, shape index: {}]   ;;  %s2623_s20 = inlined_call_operand.hbm [shape: f32[16,32], index: 20, kind: output, shape index: {}]  }
   0x1   :  { %2629 = sst [smem:[#allocation11_spill]] %s2603_s0 }
   0x2   :  { %2630 = sst [smem:[#allocation12_spill]] %s2604_s1 }
   0x3   :  { %2631 = sst [smem:[#allocation13_spill]] %s2605_s2 }
   0x4   :  { %2632 = sst [smem:[#allocation14_spill]] %s2606_s3 }
   0x5   :  { %2633 = sst [smem:[#allocation15_spill]] %s2607_s4 }
   0x6   :  { %25 = vsyncpa [#allocation3], 0 }
   0x7   :  { %26 = vsyncpa [#allocation6], 0 }
   0x8   :  { %27 = vsyncpa [#allocation4], 0  ;;  %s42_s23 = sshll.u32 %s2608_s5, 4  ;;  %s2244_s24 = smov [#allocation2]   ;;  %s43_s23 = int_to_ptr.hbm [resolvable:$true] %s42_s23 }
   0x9   :  { %s44_s2 = sshll.u32 %s2244_s24, 4  ;;  %s57_s26 = sshll.u32 %s2610_s7, 4  ;;  %s45_s2 = int_to_ptr.vmem [resolvable:$true] %s44_s2  ;;  %s58_s26 = int_to_ptr.hbm [resolvable:$true] %s57_s26 }
   0xa   :  { %s2245_s27 = smov 128   ;;  %s2246_s28 = smov 8  }
   0xb   :  { %50 = dma.hbm_to_vmem [thread:$0]  %s43_s23, 8192, %s45_s2, [#allocation3], %s2245_s27, %s2245_s27, %s2246_s28  }
   0xc   :  { %s2247_s4 = smov [#allocation5]  }
   0xd   :  { %s59_s29 = sshll.u32 %s2247_s4, 4  ;;  %s60_s29 = int_to_ptr.vmem [resolvable:$true] %s59_s29 }
   0xe   :  { %65 = dma.hbm_to_vmem [thread:$0]  %s58_s26, 4096, %s60_s29, [#allocation6], %s2245_s27, %s2245_s27, %s2246_s28  }
   0xf   :  { %2238 = dma.done.wait [#allocation3], 8192  }
  0x10   :  { %2239 = vsyncadd [#allocation3], 4294959104 }
  0x11   :  { %2240 = dma.done.wait [#allocation6], 4096  }
  0x12   :  { %2241 = vsyncadd [#allocation6], 4294963200  ;;  %v1548_v0 = vld [vmem:[#allocation2 + $0x70] sm:$0xf]  ;;  %v2032_v1 = vld [vmem:[#allocation2 + $0x74] sm:$0xf0] }
  0x13   :  { %v1612_v2 = vld [vmem:[#allocation2 + $0xf0] sm:$0xf]  ;;  %v1549_v3 = vor.u32 %v2032_v1, %v1548_v0  ;;  %v2048_v4 = vld [vmem:[#allocation2 + $0xf4] sm:$0xf0]  ;;  %v1540_v11 = vld [vmem:[#allocation2 + $0x60] sm:$0xf] }
  0x14   :  { %v1676_v5 = vld [vmem:[#allocation2 + $0x170] sm:$0xf]  ;;  %v2064_v6 = vld [vmem:[#allocation2 + $0x174] sm:$0xf0]  ;;  %v1613_v7 = vor.u32 %v2048_v4, %v1612_v2  ;;  %v2030_v13 = vld [vmem:[#allocation2 + $0x64] sm:$0xf0] }
  0x15   :  { %v1677_v8 = vor.u32 %v2064_v6, %v1676_v5  ;;  %v1740_v9 = vld [vmem:[#allocation2 + $0x1f0] sm:$0xf]  ;;  %v2080_v10 = vld [vmem:[#allocation2 + $0x1f4] sm:$0xf0]  ;;  %519 = vmatpush.bf16.msra.mxu0 %v1549_v3  ;;  %v1604_v14 = vld [vmem:[#allocation2 + $0xe0] sm:$0xf]  ;;  %v1541_v16 = vor.u32 %v2030_v13, %v1540_v11 }
  0x16   :  { %v1741_v12 = vor.u32 %v2080_v10, %v1740_v9  ;;  %v2046_v15 = vld [vmem:[#allocation2 + $0xe4] sm:$0xf0]  ;;  %533 = vmatpush.bf16.msra.mxu1 %v1613_v7  ;;  %v1668_v18 = vld [vmem:[#allocation2 + $0x160] sm:$0xf]  ;;  %v1532_v23 = vld [vmem:[#allocation2 + $0x50] sm:$0xf] }
  0x17   :  { %547 = vmatpush.bf16.msra.mxu2 %v1677_v8  ;;  %v1605_v17 = vor.u32 %v2046_v15, %v1604_v14  ;;  %v2062_v19 = vld [vmem:[#allocation2 + $0x164] sm:$0xf0]  ;;  %v1732_v20 = vld [vmem:[#allocation2 + $0x1e0] sm:$0xf]  ;;  %v2028_v24 = vld [vmem:[#allocation2 + $0x54] sm:$0xf0] }
  0x18   :  { %561 = vmatpush.bf16.msra.mxu3 %v1741_v12  ;;  %v1669_v21 = vor.u32 %v2062_v19, %v1668_v18  ;;  %v2078_v22 = vld [vmem:[#allocation2 + $0x1e4] sm:$0xf0]  ;;  %v1596_v26 = vld [vmem:[#allocation2 + $0xd0] sm:$0xf]  ;;  %v2044_v27 = vld [vmem:[#allocation2 + $0xd4] sm:$0xf0]  ;;  %v1533_v29 = vor.u32 %v2028_v24, %v1532_v23 }
  0x19   :  { %v1733_v25 = vor.u32 %v2078_v22, %v1732_v20  ;;  %v1660_v28 = vld [vmem:[#allocation2 + $0x150] sm:$0xf]  ;;  %520 = vmatpush.bf16.msra.mxu0 %v1541_v16  ;;  %v2060_v30 = vld [vmem:[#allocation2 + $0x154] sm:$0xf0]  ;;  %v1597_v33 = vor.u32 %v2044_v27, %v1596_v26  ;;  %v1524_v35 = vld [vmem:[#allocation2 + $0x40] sm:$0xf] }
  0x1a   :  { %v1724_v31 = vld [vmem:[#allocation2 + $0x1d0] sm:$0xf]  ;;  %v2076_v32 = vld [vmem:[#allocation2 + $0x1d4] sm:$0xf0]  ;;  %534 = vmatpush.bf16.msra.mxu1 %v1605_v17  ;;  %v1661_v34 = vor.u32 %v2060_v30, %v1660_v28  ;;  %v2026_v36 = vld [vmem:[#allocation2 + $0x44] sm:$0xf0] }
  0x1b   :  { %548 = vmatpush.bf16.msra.mxu2 %v1669_v21  ;;  %v1588_v37 = vld [vmem:[#allocation2 + $0xc0] sm:$0xf]  ;;  %v1725_v38 = vor.u32 %v2076_v32, %v1724_v31  ;;  %v2042_v39 = vld [vmem:[#allocation2 + $0xc4] sm:$0xf0]  ;;  %v1525_v44 = vor.u32 %v2026_v36, %v1524_v35  ;;  %v1516_v47 = vld [vmem:[#allocation2 + $0x30] sm:$0xf] }
  0x1c   :  { %562 = vmatpush.bf16.msra.mxu3 %v1733_v25  ;;  %v1652_v40 = vld [vmem:[#allocation2 + $0x140] sm:$0xf]  ;;  %v2058_v41 = vld [vmem:[#allocation2 + $0x144] sm:$0xf0]  ;;  %v1589_v45 = vor.u32 %v2042_v39, %v1588_v37  ;;  %v2024_v48 = vld [vmem:[#allocation2 + $0x34] sm:$0xf0] }
  0x1d   :  { %v1716_v42 = vld [vmem:[#allocation2 + $0x1c0] sm:$0xf]  ;;  %v2074_v43 = vld [vmem:[#allocation2 + $0x1c4] sm:$0xf0]  ;;  %521 = vmatpush.bf16.msra.mxu0 %v1533_v29  ;;  %v1653_v46 = vor.u32 %v2058_v41, %v1652_v40  ;;  %v1580_v49 = vld [vmem:[#allocation2 + $0xb0] sm:$0xf]  ;;  %v1517_v56 = vor.u32 %v2024_v48, %v1516_v47 }
  0x1e   :  { %535 = vmatpush.bf16.msra.mxu1 %v1597_v33  ;;  %v1717_v50 = vor.u32 %v2074_v43, %v1716_v42  ;;  %v2040_v51 = vld [vmem:[#allocation2 + $0xb4] sm:$0xf0]  ;;  %v1644_v52 = vld [vmem:[#allocation2 + $0x130] sm:$0xf]  ;;  %v1508_v59 = vld [vmem:[#allocation2 + $0x20] sm:$0xf] }
  0x1f   :  { %549 = vmatpush.bf16.msra.mxu2 %v1661_v34  ;;  %v2056_v53 = vld [vmem:[#allocation2 + $0x134] sm:$0xf0]  ;;  %v1708_v54 = vld [vmem:[#allocation2 + $0x1b0] sm:$0xf]  ;;  %v1581_v57 = vor.u32 %v2040_v51, %v1580_v49  ;;  %v2022_v60 = vld [vmem:[#allocation2 + $0x24] sm:$0xf0] }
  0x20   :  { %563 = vmatpush.bf16.msra.mxu3 %v1725_v38  ;;  %v2072_v55 = vld [vmem:[#allocation2 + $0x1b4] sm:$0xf0]  ;;  %v1645_v58 = vor.u32 %v2056_v53, %v1644_v52  ;;  %v1572_v61 = vld [vmem:[#allocation2 + $0xa0] sm:$0xf]  ;;  %v2038_v63 = vld [vmem:[#allocation2 + $0xa4] sm:$0xf0]  ;;  %v1509_v4 = vor.u32 %v2022_v60, %v1508_v59 }
  0x21   :  { %522 = vmatpush.bf16.msra.mxu0 %v1525_v44  ;;  %v1709_v62 = vor.u32 %v2072_v55, %v1708_v54  ;;  %v1636_v0 = vld [vmem:[#allocation2 + $0x120] sm:$0xf]  ;;  %v2054_v1 = vld [vmem:[#allocation2 + $0x124] sm:$0xf0]  ;;  %v1500_v5 = vld [vmem:[#allocation2 + $0x10] sm:$0xf]  ;;  %v1573_v6 = vor.u32 %v2038_v63, %v1572_v61 }
  0x22   :  { %536 = vmatpush.bf16.msra.mxu1 %v1589_v45  ;;  %v1700_v2 = vld [vmem:[#allocation2 + $0x1a0] sm:$0xf]  ;;  %v2070_v3 = vld [vmem:[#allocation2 + $0x1a4] sm:$0xf0]  ;;  %v1637_v7 = vor.u32 %v2054_v1, %v1636_v0  ;;  %v2020_v8 = vld [vmem:[#allocation2 + $0x14] sm:$0xf0] }
  0x23   :  { %550 = vmatpush.bf16.msra.mxu2 %v1653_v46  ;;  %v1564_v9 = vld [vmem:[#allocation2 + $0x90] sm:$0xf]  ;;  %v2036_v10 = vld [vmem:[#allocation2 + $0x94] sm:$0xf0]  ;;  %v1701_v11 = vor.u32 %v2070_v3, %v1700_v2  ;;  %v1492_v16 = vld [vmem:[#allocation2] sm:$0xf]  ;;  %v1501_v18 = vor.u32 %v2020_v8, %v1500_v5 }
  0x24   :  { %564 = vmatpush.bf16.msra.mxu3 %v1717_v50  ;;  %v1628_v12 = vld [vmem:[#allocation2 + $0x110] sm:$0xf]  ;;  %v2052_v13 = vld [vmem:[#allocation2 + $0x114] sm:$0xf0]  ;;  %v2018_v17 = vld [vmem:[#allocation2 + $0x4] sm:$0xf0]  ;;  %v1565_v23 = vor.u32 %v2036_v10, %v1564_v9 }
  0x25   :  { %523 = vmatpush.bf16.msra.mxu0 %v1517_v56  ;;  %v1692_v14 = vld [vmem:[#allocation2 + $0x190] sm:$0xf]  ;;  %v2068_v15 = vld [vmem:[#allocation2 + $0x194] sm:$0xf0]  ;;  %v1556_v19 = vld [vmem:[#allocation2 + $0x80] sm:$0xf]  ;;  %v1629_v24 = vor.u32 %v2052_v13, %v1628_v12  ;;  %v1493_v35 = vor.u32 %v2018_v17, %v1492_v16 }
  0x26   :  { %537 = vmatpush.bf16.msra.mxu1 %v1581_v57  ;;  %v2034_v20 = vld [vmem:[#allocation2 + $0x84] sm:$0xf0]  ;;  %v1620_v21 = vld [vmem:[#allocation2 + $0x100] sm:$0xf]  ;;  %v2031_v25 = vld [vmem:[#allocation2 + $0x74] sm:$0xf]  ;;  %v1693_v28 = vor.u32 %v2068_v15, %v1692_v14 }
  0x27   :  { %551 = vmatpush.bf16.msra.mxu2 %v1645_v58  ;;  %v2050_v22 = vld [vmem:[#allocation2 + $0x104] sm:$0xf0]  ;;  %v1550_v26 = vld [vmem:[#allocation2 + $0x78] sm:$0xf0]  ;;  %v2047_v27 = vld [vmem:[#allocation2 + $0xf4] sm:$0xf]  ;;  %v1557_v39 = vor.u32 %v2034_v20, %v1556_v19 }
  0x28   :  { %565 = vmatpush.bf16.msra.mxu3 %v1709_v62  ;;  %v1614_v29 = vld [vmem:[#allocation2 + $0xf8] sm:$0xf0]  ;;  %v2063_v30 = vld [vmem:[#allocation2 + $0x174] sm:$0xf]  ;;  %v1684_v32 = vld [vmem:[#allocation2 + $0x180] sm:$0xf]  ;;  %v1621_v40 = vor.u32 %v2050_v22, %v1620_v21  ;;  %v1553_v44 = vor.u32 %v2031_v25, %v1550_v26 }
  0x29   :  { %524 = vmatpush.bf16.msra.mxu0 %v1509_v4  ;;  %v1678_v31 = vld [vmem:[#allocation2 + $0x178] sm:$0xf0]  ;;  %v2066_v33 = vld [vmem:[#allocation2 + $0x184] sm:$0xf0]  ;;  %v2079_v34 = vld [vmem:[#allocation2 + $0x1f4] sm:$0xf]  ;;  %v1617_v45 = vor.u32 %v2047_v27, %v1614_v29 }
  0x2a   :  { %538 = vmatpush.bf16.msra.mxu1 %v1573_v6  ;;  %v1742_v36 = vld [vmem:[#allocation2 + $0x1f8] sm:$0xf0]  ;;  %s2634_s30 = sld [smem:[#allocation12_spill]]  ;;  %v2029_v41 = vld [vmem:[#allocation2 + $0x64] sm:$0xf]  ;;  %v1681_v49 = vor.u32 %v2063_v30, %v1678_v31  ;;  %v1685_v50 = vor.u32 %v2066_v33, %v1684_v32  ;;  %vm656_vm0 = vcmask 261120  }
  0x2b   :  { %552 = vmatpush.bf16.msra.mxu2 %v1637_v7  ;;  %v1542_v42 = vld [vmem:[#allocation2 + $0x68] sm:$0xf0]  ;;  %v2045_v51 = vld [vmem:[#allocation2 + $0xe4] sm:$0xf]  ;;  %v1745_v54 = vor.u32 %v2079_v34, %v1742_v36  ;;  %v2027_v1 = vld [vmem:[#allocation2 + $0x54] sm:$0xf] }
  0x2c   :  { %566 = vmatpush.bf16.msra.mxu3 %v1701_v11  ;;  %v1606_v52 = vld [vmem:[#allocation2 + $0xe8] sm:$0xf0]  ;;  %v2061_v53 = vld [vmem:[#allocation2 + $0x164] sm:$0xf]  ;;  %v1545_v63 = vor.u32 %v2029_v41, %v1542_v42  ;;  %v1534_v4 = vld [vmem:[#allocation2 + $0x58] sm:$0xf0] }
  0x2d   :  { %525 = vmatpush.bf16.msra.mxu0 %v1501_v18  ;;  %v1670_v56 = vld [vmem:[#allocation2 + $0x168] sm:$0xf0]  ;;  %v2077_v59 = vld [vmem:[#allocation2 + $0x1e4] sm:$0xf]  ;;  %v1609_v0 = vor.u32 %v2045_v51, %v1606_v52  ;;  %v2043_v5 = vld [vmem:[#allocation2 + $0xd4] sm:$0xf]  ;;  %v1537_v12 = vor.u32 %v2027_v1, %v1534_v4 }
  0x2e   :  { %539 = vmatpush.bf16.msra.mxu1 %v1565_v23  ;;  %v1734_v60 = vld [vmem:[#allocation2 + $0x1e8] sm:$0xf0]  ;;  %v1673_v2 = vor.u32 %v2061_v53, %v1670_v56  ;;  %v1598_v6 = vld [vmem:[#allocation2 + $0xd8] sm:$0xf0]  ;;  %v2059_v8 = vld [vmem:[#allocation2 + $0x154] sm:$0xf] }
  0x2f   :  { %553 = vmatpush.bf16.msra.mxu2 %v1629_v24  ;;  %v1737_v7 = vor.u32 %v2077_v59, %v1734_v60  ;;  %v1662_v9 = vld [vmem:[#allocation2 + $0x158] sm:$0xf0]  ;;  %v2075_v10 = vld [vmem:[#allocation2 + $0x1d4] sm:$0xf]  ;;  %v1601_v13 = vor.u32 %v2043_v5, %v1598_v6  ;;  %v2025_v14 = vld [vmem:[#allocation2 + $0x44] sm:$0xf] }
  0x30   :  { %v1484_v37 = vld [vmem:[%s2634_s30 + $0x8] sm:$0xf]  ;;  %v2011_v38 = vld [vmem:[%s2634_s30 + $0x14] sm:$0xf0]  ;;  %v1476_v43 = vld [vmem:[%s2634_s30] sm:$0xf]  ;;  %567 = vmatpush.bf16.msra.mxu3 %v1693_v28  ;;  %v1665_v15 = vor.u32 %v2059_v8, %v1662_v9 }
  0x31   :  { %v2010_v46 = vld [vmem:[%s2634_s30 + $0xc] sm:$0xf0]  ;;  %v2008_v47 = vld [vmem:[%s2634_s30 + $0x4] sm:$0xf]  ;;  %v1478_v48 = vld [vmem:[%s2634_s30 + $0x10] sm:$0xf0]  ;;  %526 = vmatpush.bf16.msra.mxu0 %v1493_v35  ;;  %v2386_v55 = vor.u32 %v2011_v38, %v1484_v37 }
  0x32   :  { %v2009_v57 = vld [vmem:[%s2634_s30 + $0xc] sm:$0xf]  ;;  %v1486_v58 = vld [vmem:[%s2634_s30 + $0x18] sm:$0xf0]  ;;  %540 = vmatpush.bf16.msra.mxu1 %v1557_v39  ;;  %v2394_v61 = vor.u32 %v2010_v46, %v1476_v43  ;;  %v2396_v62 = vor.u32 %v2008_v47, %v1478_v48  ;;  %v2041_v17 = vld [vmem:[#allocation2 + $0xc4] sm:$0xf] }
  0x33   :  { %554 = vmatpush.bf16.msra.mxu2 %v1621_v40  ;;  %v2398_v3 = vor.u32 %v2009_v57, %v1486_v58  ;;  %v1726_v11 = vld [vmem:[#allocation2 + $0x1d8] sm:$0xf0]  ;;  %v1526_v16 = vld [vmem:[#allocation2 + $0x48] sm:$0xf0]  ;;  %v2057_v20 = vld [vmem:[#allocation2 + $0x144] sm:$0xf] }
  0x34   :  { %568 = vmatpush.bf16.msra.mxu3 %v1685_v50  ;;  %527 = vmatmul.bf16.vlgmr.msra.gmra.mxu0 %v2394_v61  ;;  %v1590_v18 = vld [vmem:[#allocation2 + $0xc8] sm:$0xf0]  ;;  %v1729_v19 = vor.u32 %v2075_v10, %v1726_v11  ;;  %v2073_v22 = vld [vmem:[#allocation2 + $0x1c4] sm:$0xf]  ;;  %v1529_v24 = vor.u32 %v2025_v14, %v1526_v16  ;;  %v2023_v26 = vld [vmem:[#allocation2 + $0x34] sm:$0xf] }
  0x35   :  { %575 = vmatpush.bf16.msrb.mxu0 %v1553_v44  ;;  %541 = vmatmul.bf16.vlgmr.msra.gmra.mxu1 %v2396_v62  ;;  %v1654_v21 = vld [vmem:[#allocation2 + $0x148] sm:$0xf0]  ;;  %v1593_v25 = vor.u32 %v2041_v17, %v1590_v18  ;;  %v1518_v28 = vld [vmem:[#allocation2 + $0x38] sm:$0xf0]  ;;  %v2039_v29 = vld [vmem:[#allocation2 + $0xb4] sm:$0xf] }
  0x36   :  { %589 = vmatpush.bf16.msrb.mxu1 %v1617_v45  ;;  %555 = vmatmul.bf16.vlgmr.msra.gmra.mxu2 %v2386_v55  ;;  %v1718_v23 = vld [vmem:[#allocation2 + $0x1c8] sm:$0xf0]  ;;  %v1657_v27 = vor.u32 %v2057_v20, %v1654_v21  ;;  %v1582_v30 = vld [vmem:[#allocation2 + $0xb8] sm:$0xf0]  ;;  %v2055_v32 = vld [vmem:[#allocation2 + $0x134] sm:$0xf]  ;;  %v1521_v36 = vor.u32 %v2023_v26, %v1518_v28 }
  0x37   :  { %603 = vmatpush.bf16.msrb.mxu2 %v1681_v49  ;;  %569 = vmatmul.bf16.vlgmr.msra.gmra.mxu3 %v2398_v3  ;;  %v1721_v31 = vor.u32 %v2073_v22, %v1718_v23  ;;  %v1646_v33 = vld [vmem:[#allocation2 + $0x138] sm:$0xf0]  ;;  %v2071_v34 = vld [vmem:[#allocation2 + $0x1b4] sm:$0xf]  ;;  %v1585_v37 = vor.u32 %v2039_v29, %v1582_v30  ;;  %v2021_v38 = vld [vmem:[#allocation2 + $0x24] sm:$0xf] }
  0x38   :  { %617 = vmatpush.bf16.msrb.mxu3 %v1745_v54  ;;  %v1710_v35 = vld [vmem:[#allocation2 + $0x1b8] sm:$0xf0]  ;;  %v1510_v39 = vld [vmem:[#allocation2 + $0x28] sm:$0xf0]  ;;  %v1649_v40 = vor.u32 %v2055_v32, %v1646_v33  ;;  %v2037_v41 = vld [vmem:[#allocation2 + $0xa4] sm:$0xf] }
  0x39   :  { %576 = vmatpush.bf16.msrb.mxu0 %v1545_v63  ;;  %v1574_v42 = vld [vmem:[#allocation2 + $0xa8] sm:$0xf0]  ;;  %v2053_v43 = vld [vmem:[#allocation2 + $0x124] sm:$0xf]  ;;  %v1713_v44 = vor.u32 %v2071_v34, %v1710_v35  ;;  %v2019_v48 = vld [vmem:[#allocation2 + $0x14] sm:$0xf]  ;;  %v1513_v51 = vor.u32 %v2021_v38, %v1510_v39 }
  0x3a   :  { %590 = vmatpush.bf16.msrb.mxu1 %v1609_v0  ;;  %v1638_v45 = vld [vmem:[#allocation2 + $0x128] sm:$0xf0]  ;;  %v2069_v46 = vld [vmem:[#allocation2 + $0x1a4] sm:$0xf]  ;;  %v1502_v49 = vld [vmem:[#allocation2 + $0x18] sm:$0xf0]  ;;  %v1577_v52 = vor.u32 %v2037_v41, %v1574_v42 }
  0x3b   :  { %604 = vmatpush.bf16.msrb.mxu2 %v1673_v2  ;;  %v1702_v47 = vld [vmem:[#allocation2 + $0x1a8] sm:$0xf0]  ;;  %v2035_v50 = vld [vmem:[#allocation2 + $0x94] sm:$0xf]  ;;  %v1641_v53 = vor.u32 %v2053_v43, %v1638_v45  ;;  %v1566_v54 = vld [vmem:[#allocation2 + $0x98] sm:$0xf0]  ;;  %v1505_v63 = vor.u32 %v2019_v48, %v1502_v49 }
  0x3c   :  { %618 = vmatpush.bf16.msrb.mxu3 %v1737_v7  ;;  %v1705_v56 = vor.u32 %v2069_v46, %v1702_v47  ;;  %v2051_v57 = vld [vmem:[#allocation2 + $0x114] sm:$0xf]  ;;  %v1630_v58 = vld [vmem:[#allocation2 + $0x118] sm:$0xf0]  ;;  %v1569_v0 = vor.u32 %v2035_v50, %v1566_v54  ;;  %v2017_v1 = vld [vmem:[#allocation2 + $0x4] sm:$0xf] }
  0x3d   :  { %577 = vmatpush.bf16.msrb.mxu0 %v1537_v12  ;;  %v2067_v59 = vld [vmem:[#allocation2 + $0x194] sm:$0xf]  ;;  %v1694_v60 = vld [vmem:[#allocation2 + $0x198] sm:$0xf0]  ;;  %v1494_v2 = vld [vmem:[#allocation2 + $0x8] sm:$0xf0]  ;;  %v1633_v5 = vor.u32 %v2051_v57, %v1630_v58 }
  0x3e   :  { %591 = vmatpush.bf16.msrb.mxu1 %v1601_v13  ;;  %v2033_v4 = vld [vmem:[#allocation2 + $0x84] sm:$0xf]  ;;  %v1558_v6 = vld [vmem:[#allocation2 + $0x88] sm:$0xf0]  ;;  %v1697_v9 = vor.u32 %v2067_v59, %v1694_v60  ;;  %s2635_s21 = sld [smem:[#allocation15_spill]]  ;;  %v1497_v16 = vor.u32 %v2017_v1, %v1494_v2  ;;  %vm977_vm1 = vcmask 1043456  }
  0x3f   :  { %605 = vmatpush.bf16.msrb.mxu2 %v1665_v15  ;;  %v2049_v7 = vld [vmem:[#allocation2 + $0x104] sm:$0xf]  ;;  %v1622_v8 = vld [vmem:[#allocation2 + $0x108] sm:$0xf0]  ;;  %v1561_v17 = vor.u32 %v2033_v4, %v1558_v6  ;;  %s2636_s22 = sld [smem:[#allocation11_spill]]  ;;  %vm973_vm2 = vcmask 64512  }
  0x40   :  { %619 = vmatpush.bf16.msrb.mxu3 %v1729_v19  ;;  %v2065_v10 = vld [vmem:[#allocation2 + $0x184] sm:$0xf]  ;;  %v1686_v13 = vld [vmem:[#allocation2 + $0x188] sm:$0xf0]  ;;  %v1625_v18 = vor.u32 %v2049_v7, %v1622_v8  ;;  %v1826_v29 = vld [vmem:[#allocation5 + $0x70] sm:$0xf] }
  0x41   :  { %578 = vmatpush.bf16.msrb.mxu0 %v1529_v24  ;;  %v1689_v20 = vor.u32 %v2065_v10, %v1686_v13  ;;  %v2096_v30 = vld [vmem:[#allocation5 + $0x74] sm:$0xf0]  ;;  %v2095_v32 = vld [vmem:[#allocation5 + $0x74] sm:$0xf]  ;;  %v1892_v35 = vld [vmem:[#allocation5 + $0xf8] sm:$0xf0] }
  0x42   :  { %592 = vmatpush.bf16.msrb.mxu1 %v1593_v25  ;;  %v2111_v34 = vld [vmem:[#allocation5 + $0xf4] sm:$0xf]  ;;  %v2094_v38 = vld [vmem:[#allocation5 + $0x64] sm:$0xf0]  ;;  %v1882_v39 = vld [vmem:[#allocation5 + $0xe0] sm:$0xf] }
  0x43   :  { %606 = vmatpush.bf16.msrb.mxu2 %v1657_v27  ;;  %v2110_v41 = vld [vmem:[#allocation5 + $0xe4] sm:$0xf0]  ;;  %v2093_v42 = vld [vmem:[#allocation5 + $0x64] sm:$0xf]  ;;  %v1820_v43 = vld [vmem:[#allocation5 + $0x68] sm:$0xf0] }
  0x44   :  { %620 = vmatpush.bf16.msrb.mxu3 %v1721_v31  ;;  %v1760_v11 = vld [vmem:[%s2635_s21 + $0x10] sm:$0xf]  ;;  %v2016_v12 = vld [vmem:[%s2635_s21 + $0x14] sm:$0xf0]  ;;  %v2015_v14 = vld [vmem:[%s2635_s21 + $0x14] sm:$0xf]  ;;  %v1827_v31 = vor.u32 %v2096_v30, %v1826_v29  ;;  %v1823_v45 = vor.u32 %v2093_v42, %v1820_v43 }
  0x45   :  { %579 = vmatpush.bf16.msrb.mxu0 %v1521_v36  ;;  %v1762_v15 = vld [vmem:[%s2635_s21 + $0x18] sm:$0xf0]  ;;  %v1761_v19 = vor.u32 %v2016_v12, %v1760_v11  ;;  %v1752_v22 = vld [vmem:[%s2635_s21] sm:$0xf]  ;;  %v2014_v23 = vld [vmem:[%s2635_s21 + $0x4] sm:$0xf0]  ;;  %v1895_v36 = vor.u32 %v2111_v34, %v1892_v35 }
  0x46   :  { %593 = vmatpush.bf16.msrb.mxu1 %v1585_v37  ;;  %v1765_v21 = vor.u32 %v2015_v14, %v1762_v15  ;;  %v2013_v24 = vld [vmem:[%s2635_s21 + $0x4] sm:$0xf]  ;;  %v1754_v25 = vld [vmem:[%s2635_s21 + $0x8] sm:$0xf0]  ;;  %v1753_v26 = vor.u32 %v2014_v23, %v1752_v22  ;;  %v1818_v37 = vld [vmem:[#allocation5 + $0x60] sm:$0xf] }
  0x47   :  { %607 = vmatpush.bf16.msrb.mxu2 %v1649_v40  ;;  %v1757_v27 = vor.u32 %v2013_v24, %v1754_v25  ;;  %v2007_v28 = vld [vmem:[%s2636_s22] sm:$0xff]  ;;  %v1819_v40 = vor.u32 %v2094_v38, %v1818_v37  ;;  %v1884_v47 = vld [vmem:[#allocation5 + $0xe8] sm:$0xf0]  ;;  %v1810_v49 = vld [vmem:[#allocation5 + $0x50] sm:$0xf]  ;;  %s2637_s3 = sld [smem:[#allocation13_spill]] }
  0x48   :  { %621 = vmatpush.bf16.msrb.mxu3 %v1713_v44  ;;  %v1883_v44 = vor.u32 %v2110_v41, %v1882_v39  ;;  %v2109_v46 = vld [vmem:[#allocation5 + $0xe4] sm:$0xf]  ;;  %v2092_v50 = vld [vmem:[#allocation5 + $0x54] sm:$0xf0]  ;;  %v2091_v54 = vld [vmem:[#allocation5 + $0x54] sm:$0xf] }
  0x49   :  { %580 = vmatpush.bf16.msrb.mxu0 %v1513_v51  ;;  %v1887_v48 = vor.u32 %v2109_v46, %v1884_v47  ;;  %v1874_v51 = vld [vmem:[#allocation5 + $0xd0] sm:$0xf]  ;;  %v2107_v59 = vld [vmem:[#allocation5 + $0xd4] sm:$0xf]  ;;  %v1876_v60 = vld [vmem:[#allocation5 + $0xd8] sm:$0xf0] }
  0x4a   :  { %594 = vmatpush.bf16.msrb.mxu1 %v1577_v52  ;;  %v1811_v52 = vor.u32 %v2092_v50, %v1810_v49  ;;  %v2090_v1 = vld [vmem:[#allocation5 + $0x44] sm:$0xf0]  ;;  %v1866_v2 = vld [vmem:[#allocation5 + $0xc0] sm:$0xf]  ;;  %v2089_v6 = vld [vmem:[#allocation5 + $0x44] sm:$0xf] }
  0x4b   :  { %608 = vmatpush.bf16.msrb.mxu2 %v1641_v53  ;;  %v2108_v53 = vld [vmem:[#allocation5 + $0xd4] sm:$0xf0]  ;;  %v1804_v7 = vld [vmem:[#allocation5 + $0x48] sm:$0xf0]  ;;  %v2105_v12 = vld [vmem:[#allocation5 + $0xc4] sm:$0xf] }
  0x4c   :  { %622 = vmatpush.bf16.msrb.mxu3 %v1705_v56  ;;  %v1812_v56 = vld [vmem:[#allocation5 + $0x58] sm:$0xf0]  ;;  %v1875_v57 = vor.u32 %v2108_v53, %v1874_v51  ;;  %v1807_v11 = vor.u32 %v2089_v6, %v1804_v7  ;;  %v1868_v13 = vld [vmem:[#allocation5 + $0xc8] sm:$0xf0]  ;;  %v1794_v15 = vld [vmem:[#allocation5 + $0x30] sm:$0xf] }
  0x4d   :  { %581 = vmatpush.bf16.msrb.mxu0 %v1505_v63  ;;  %v1815_v58 = vor.u32 %v2091_v54, %v1812_v56  ;;  %v1879_v63 = vor.u32 %v2107_v59, %v1876_v60  ;;  %v1871_v14 = vor.u32 %v2105_v12, %v1868_v13  ;;  %v1796_v22 = vld [vmem:[#allocation5 + $0x38] sm:$0xf0]  ;;  %v2103_v23 = vld [vmem:[#allocation5 + $0xb4] sm:$0xf]  ;;  %v1850_v29 = vld [vmem:[#allocation5 + $0xa0] sm:$0xf] }
  0x4e   :  { %595 = vmatpush.bf16.msrb.mxu1 %v1569_v0  ;;  %v1802_v0 = vld [vmem:[#allocation5 + $0x40] sm:$0xf]  ;;  %v1860_v25 = vld [vmem:[#allocation5 + $0xb8] sm:$0xf0]  ;;  %v1852_v34 = vld [vmem:[#allocation5 + $0xa8] sm:$0xf0] }
  0x4f   :  { %609 = vmatpush.bf16.msrb.mxu2 %v1633_v5  ;;  %v1803_v4 = vor.u32 %v2090_v1, %v1802_v0  ;;  %v2106_v5 = vld [vmem:[#allocation5 + $0xc4] sm:$0xf0]  ;;  %v1778_v39 = vld [vmem:[#allocation5 + $0x10] sm:$0xf]  ;;  %v2100_v43 = vld [vmem:[#allocation5 + $0x94] sm:$0xf0] }
  0x50   :  { %623 = vmatpush.bf16.msrb.mxu3 %v1697_v9  ;;  %v1867_v10 = vor.u32 %v2106_v5, %v1866_v2  ;;  %v1842_v41 = vld [vmem:[#allocation5 + $0x90] sm:$0xf]  ;;  %v1844_v49 = vld [vmem:[#allocation5 + $0x98] sm:$0xf0]  ;;  %v1770_v51 = vld [vmem:[#allocation5] sm:$0xf] }
  0x51   :  { %582 = vmatpush.bf16.msrb.mxu0 %v1497_v16  ;;  %v2088_v16 = vld [vmem:[#allocation5 + $0x34] sm:$0xf0]  ;;  %v1843_v46 = vor.u32 %v2100_v43, %v1842_v41  ;;  %v1834_v53 = vld [vmem:[#allocation5 + $0x80] sm:$0xf]  ;;  %v2098_v56 = vld [vmem:[#allocation5 + $0x84] sm:$0xf0] }
  0x52   :  { %596 = vmatpush.bf16.msrb.mxu1 %v1561_v17  ;;  %v1858_v17 = vld [vmem:[#allocation5 + $0xb0] sm:$0xf]  ;;  %v1835_v59 = vor.u32 %v2098_v56, %v1834_v53  ;;  %v1836_v0 = vld [vmem:[#allocation5 + $0x88] sm:$0xf0]  ;;  %v962_v7 = vld [vmem:[%s2614_s11] sm:$0xff]  ;;  %s2638_s24 = sld [smem:[#allocation14_spill]] }
  0x53   :  { %610 = vmatpush.bf16.msrb.mxu2 %v1625_v18  ;;  %v1795_v18 = vor.u32 %v2088_v16, %v1794_v15  ;;  %v2127_v53 = vld [vmem:[%s2612_s9 + $0x70] sm:$0xff]  ;;  %v2126_v56 = vld [vmem:[%s2612_s9 + $0x68] sm:$0xff]  ;;  %s1460_s29 = sshll.u32 %s2623_s20, 4  ;;  %s1461_s29 = int_to_ptr.hbm [resolvable:$true] %s1460_s29 }
  0x54   :  { %624 = vmatpush.bf16.msrb.mxu3 %v1689_v20  ;;  %583 = vmatmul.bf16.vlgmr.msrb.gmra.mxu0 %v2394_v61  ;;  %v1890_v61 = vld [vmem:[#allocation5 + $0xf0] sm:$0xf]  ;;  %v2087_v20 = vld [vmem:[#allocation5 + $0x34] sm:$0xf] }
  0x55   :  { %666 = vmatpush.bf16.msra.mxu0 %v1761_v19  ;;  %597 = vmatmul.bf16.vlgmr.msrb.gmra.mxu1 %v2396_v62  ;;  %v2112_v62 = vld [vmem:[#allocation5 + $0xf4] sm:$0xf0]  ;;  %v1799_v24 = vor.u32 %v2087_v20, %v1796_v22 }
  0x56   :  { %680 = vmatpush.bf16.msra.mxu1 %v1765_v21  ;;  %611 = vmatmul.bf16.vlgmr.msrb.gmra.mxu2 %v2386_v55  ;;  %v1828_v55 = vld [vmem:[#allocation5 + $0x78] sm:$0xf0]  ;;  %v1891_v33 = vor.u32 %v2112_v62, %v1890_v61  ;;  %v2104_v19 = vld [vmem:[#allocation5 + $0xb4] sm:$0xf0]  ;;  %v2085_v62 = vld [vmem:[#allocation5 + $0x24] sm:$0xf] }
  0x57   :  { %625 = vmatmul.bf16.vlgmr.msrb.gmra.mxu3 %v2398_v3  ;;  %v1831_v3 = vor.u32 %v2095_v32, %v1828_v55  ;;  %902 = vmatpush.bf16.msra.mxu2 %v1827_v31  ;;  %v1859_v21 = vor.u32 %v2104_v19, %v1858_v17  ;;  %v2102_v31 = vld [vmem:[#allocation5 + $0xa4] sm:$0xf0]  ;;  %v1788_v32 = vld [vmem:[#allocation5 + $0x28] sm:$0xf0] }
  0x58   :  { %916 = vmatpush.bf16.msra.mxu3 %v1891_v33  ;;  %v1851_v55 = vor.u32 %v2102_v31, %v1850_v29  ;;  %v1791_v33 = vor.u32 %v2085_v62, %v1788_v32  ;;  %v688_v29 = vld [vmem:[%s2609_s6] sm:$0x3] }
  0x59   :  { %667 = vmatpush.bf16.msra.mxu0 %v1753_v26  ;;  %v1863_v26 = vor.u32 %v2103_v23, %v1860_v25 }
  0x5a   :  { %681 = vmatpush.bf16.msra.mxu1 %v1757_v27  ;;  %v1786_v27 = vld [vmem:[#allocation5 + $0x20] sm:$0xf] }
  0x5b   :  { %903 = vmatpush.bf16.msra.mxu2 %v1819_v40  ;;  %v2084_v40 = vld [vmem:[#allocation5 + $0x14] sm:$0xf0] }
  0x5c   :  { %917 = vmatpush.bf16.msra.mxu3 %v1883_v44  ;;  %v1779_v42 = vor.u32 %v2084_v40, %v1778_v39  ;;  %v2083_v44 = vld [vmem:[#allocation5 + $0x14] sm:$0xf] }
  0x5d   :  { %930 = vmatpush.bf16.msrb.mxu0 %v1831_v3  ;;  %v2101_v3 = vld [vmem:[#allocation5 + $0xa4] sm:$0xf] }
  0x5e   :  { %944 = vmatpush.bf16.msrb.mxu1 %v1895_v36  ;;  %v1855_v36 = vor.u32 %v2101_v3, %v1852_v34 }
  0x5f   :  { %904 = vmatpush.bf16.msra.mxu2 %v1811_v52  ;;  %v2082_v52 = vld [vmem:[#allocation5 + $0x4] sm:$0xf0] }
  0x60   :  { %918 = vmatpush.bf16.msra.mxu3 %v1875_v57  ;;  %v1771_v54 = vor.u32 %v2082_v52, %v1770_v51  ;;  %v2081_v57 = vld [vmem:[#allocation5 + $0x4] sm:$0xf]  ;;  %v2128_v51 = vld [vmem:[%s2612_s9 + $0x78] sm:$0xff]  ;;  %v2119_v52 = vld [vmem:[%s2612_s9 + $0x30] sm:$0xff] }
  0x61   :  { %931 = vmatpush.bf16.msrb.mxu0 %v1823_v45  ;;  %v1780_v45 = vld [vmem:[#allocation5 + $0x18] sm:$0xf0] }
  0x62   :  { %945 = vmatpush.bf16.msrb.mxu1 %v1887_v48  ;;  %v1783_v47 = vor.u32 %v2083_v44, %v1780_v45  ;;  %v2099_v48 = vld [vmem:[#allocation5 + $0x94] sm:$0xf] }
  0x63   :  { %905 = vmatpush.bf16.msra.mxu2 %v1803_v4  ;;  %v1847_v50 = vor.u32 %v2099_v48, %v1844_v49  ;;  %v2012_v49 = vld [vmem:[%s2637_s3] sm:$0xff] }
  0x64   :  { %1766 = vmatmul.msk.bf16.vlgmr.msra.gmra.mxu0 %vm656_vm0, %v2007_v28  ;;  %919 = vmatpush.bf16.msra.mxu3 %v1867_v10  ;;  %v969_v10 = vunpack.c.l.b16 %v962_v7 }
  0x65   :  { %1767 = vmatmul.msk.bf16.vlgmr.msra.gmra.mxu1 %vm656_vm0, %v2007_v28  ;;  %932 = vmatpush.bf16.msrb.mxu0 %v1815_v58  ;;  %v2086_v28 = vld [vmem:[#allocation5 + $0x24] sm:$0xf0]  ;;  %v1772_v58 = vld [vmem:[#allocation5 + $0x8] sm:$0xf0] }
  0x66   :  { %946 = vmatpush.bf16.msrb.mxu1 %v1879_v63  ;;  %v1787_v61 = vor.u32 %v2086_v28, %v1786_v27  ;;  %v1775_v60 = vor.u32 %v2081_v57, %v1772_v58  ;;  %v2097_v63 = vld [vmem:[#allocation5 + $0x84] sm:$0xf]  ;;  %v971_v12 = vpack.c.b16 %v969_v10, %v969_v10 }
  0x67   :  { %906 = vmatpush.bf16.msra.mxu2 %v1795_v18  ;;  %v1839_v2 = vor.u32 %v2097_v63, %v1836_v0  ;;  %v2117_v57 = vld [vmem:[%s2612_s9 + $0x20] sm:$0xff]  ;;  %v2115_v63 = vld [vmem:[%s2612_s9 + $0x10] sm:$0xff] }
  0x68   :  { %920 = vmatpush.bf16.msra.mxu3 %v1859_v21  ;;  %v979_v15 = vsel %vm977_vm1, %v971_v12, 0  ;;  %v2125_v58 = vld [vmem:[%s2612_s9 + $0x60] sm:$0xff]  ;;  %v2123_v0 = vld [vmem:[%s2612_s9 + $0x50] sm:$0xff] }
  0x69   :  { %933 = vmatpush.bf16.msrb.mxu0 %v1807_v11  ;;  %v970_v11 = vunpack.c.h.b16 %v962_v7 }
  0x6a   :  { %947 = vmatpush.bf16.msrb.mxu1 %v1871_v14 }
  0x6b   :  { %907 = vmatpush.bf16.msra.mxu2 %v1787_v61  ;;  %v972_v13 = vpack.c.b16 %v970_v11, %v970_v11 }
  0x6c   :  { %921 = vmatpush.bf16.msra.mxu3 %v1851_v55 }
  0x6d   :  { %934 = vmatpush.bf16.msrb.mxu0 %v1799_v24  ;;  %v982_v16 = vsel %vm977_vm1, %v972_v13, 0 }
  0x6e   :  { %948 = vmatpush.bf16.msrb.mxu1 %v1863_v26 }
  0x6f   :  { %908 = vmatpush.bf16.msra.mxu2 %v1779_v42 }
  0x70   :  { %922 = vmatpush.bf16.msra.mxu3 %v1843_v46 }
  0x71   :  { %935 = vmatpush.bf16.msrb.mxu0 %v1791_v33 }
  0x72   :  { %949 = vmatpush.bf16.msrb.mxu1 %v1855_v36 }
  0x73   :  { %909 = vmatpush.bf16.msra.mxu2 %v1771_v54  ;;  %v2118_v54 = vld [vmem:[%s2612_s9 + $0x28] sm:$0xff] }
  0x74   :  { %923 = vmatpush.bf16.msra.mxu3 %v1835_v59  ;;  %v2116_v59 = vld [vmem:[%s2612_s9 + $0x18] sm:$0xff] }
  0x75   :  { %936 = vmatpush.bf16.msrb.mxu0 %v1783_v47 }
  0x76   :  { %950 = vmatpush.bf16.msrb.mxu1 %v1847_v50  ;;  %v2120_v50 = vld [vmem:[%s2612_s9 + $0x38] sm:$0xff] }
  0x77   :  { %991 = vmatpush.bf16.msrb.mxu2 %v979_v15 }
  0x78   :  { %1005 = vmatpush.bf16.msrb.mxu3 %v982_v16 }
  0x79   :  { %937 = vmatpush.bf16.msrb.mxu0 %v1775_v60  ;;  %v2124_v60 = vld [vmem:[%s2612_s9 + $0x58] sm:$0xff] }
  0x7a   :  { %951 = vmatpush.bf16.msrb.mxu1 %v1839_v2  ;;  %v2122_v2 = vld [vmem:[%s2612_s9 + $0x48] sm:$0xff] }
  0x7d   :  { %1166 = vmatpush.bf16.msra.mxu0 %v2120_v50 }
  0x7e   :  { %1180 = vmatpush.bf16.msra.mxu1 %v2128_v51 }
  0x81   :  { %1167 = vmatpush.bf16.msra.mxu0 %v2119_v52 }
  0x82   :  { %1181 = vmatpush.bf16.msra.mxu1 %v2127_v53 }
  0x85   :  { %1168 = vmatpush.bf16.msra.mxu0 %v2118_v54 }
  0x86   :  { %1182 = vmatpush.bf16.msra.mxu1 %v2126_v56 }
  0x89   :  { %1169 = vmatpush.bf16.msra.mxu0 %v2117_v57 }
  0x8a   :  { %1183 = vmatpush.bf16.msra.mxu1 %v2125_v58 }
  0x8d   :  { %1170 = vmatpush.bf16.msra.mxu0 %v2116_v59 }
  0x8e   :  { %1184 = vmatpush.bf16.msra.mxu1 %v2124_v60 }
  0x91   :  { %1171 = vmatpush.bf16.msra.mxu0 %v2115_v63 }
  0x92   :  { %1185 = vmatpush.bf16.msra.mxu1 %v2123_v0 }
  0x96   :  { %1186 = vmatpush.bf16.msra.mxu1 %v2122_v2 }
  0xb1   :  { %v2437_v8 = vpop.f32.mrf.mxu0 }
  0xb2   :  { %v2439_v9 = vpop.f32.mrf.mxu1 }
  0xb3   :  { %v543_v20 = vadd.f32 %v2439_v9, %v2437_v8  ;;  %v690_v9 = vperm.slane %v688_v29, 0 }
  0xb9   :  { %v2441_v30 = vpop.f32.mrf.mxu2  ;;  %v530_v37 = vpop.f32.mrf.mxu0 }
  0xba   :  { %v2443_v35 = vpop.f32.mrf.mxu3  ;;  %v544_v38 = vpop.f32.mrf.mxu1  ;;  %v557_v22 = vadd.f32 %v2441_v30, %v543_v20  ;;  %v691_v30 = vperm.slane %v688_v29, 1 }
  0xbb   :  { %v545_v23 = vadd.f32 %v544_v38, %v530_v37 }
  0xbc   :  { %v571_v61 = vadd.f32 %v2443_v35, %v557_v22 }
  0xc1   :  { %v558_v1 = vpop.f32.mrf.mxu2 }
  0xc2   :  { %v572_v6 = vpop.f32.mrf.mxu3  ;;  %v559_v31 = vadd.f32 %v558_v1, %v545_v23  ;;  %v2114_v1 = vld [vmem:[%s2612_s9 + $0x8] sm:$0xff] }
  0xc3   :  { %1172 = vmatpush.bf16.msra.mxu0 %v2114_v1 }
  0xc4   :  { %v573_v3 = vadd.f32 %v572_v6, %v559_v31  ;;  %v107_v6 = vld [vmem:[%s2637_s3] sm:$0xff]  }
  0xc5   :  { %v1016_v11 = vunpack.c.l.bf16 %v107_v6 }
  0xc7   :  { %v1018_v12 = vsel %vm973_vm2, %v1016_v11, 0.0 }
  0xc8   :  { %1019 = vadd.xlane.f32.xlu0 %v1018_v12 }
  0xd1   :  { %v584_v4 = vpop.f32.mrf.mxu0 }
  0xd2   :  { %v598_v5 = vpop.f32.mrf.mxu1 }
  0xd3   :  { %v599_v21 = vadd.f32 %v598_v5, %v584_v4  ;;  %v2113_v4 = vld [vmem:[%s2612_s9] sm:$0xff] }
  0xd4   :  { %v2121_v5 = vld [vmem:[%s2612_s9 + $0x40] sm:$0xff]  ;;  %1173 = vmatpush.bf16.msra.mxu0 %v2113_v4 }
  0xd5   :  { %1187 = vmatpush.bf16.msra.mxu1 %v2121_v5 }
  0xd9   :  { %v612_v14 = vpop.f32.mrf.mxu2  ;;  %v586_v17 = vpop.f32.mrf.mxu0 }
  0xda   :  { %v600_v18 = vpop.f32.mrf.mxu1  ;;  %v626_v19 = vpop.f32.mrf.mxu3  ;;  %v613_v24 = vadd.f32 %v612_v14, %v599_v21  ;;  %v1017_v14 = vunpack.c.h.bf16 %v107_v6  ;;  %v2248_v6 = vmov 32.0  }
  0xdb   :  { %v601_v28 = vadd.f32 %v600_v18, %v586_v17  ;;  %v736_v18 = vld [vmem:[%s2611_s8] sm:$0x3]  ;;  %2156 = vrcp.f32 %v2248_v6 }
  0xdc   :  { %v627_v62 = vadd.f32 %v626_v19, %v613_v24  ;;  %v1021_v17 = vsel %vm973_vm2, %v1017_v14, 0.0  ;;  %v739_v20 = vperm.slane %v736_v18, 1  ;;  %v738_v21 = vperm.slane %v736_v18, 0  ;;  %v2153_v6 = vld [vmem:[%s2620_s17] ss:$0 sm:$0xff] }
  0xdd   :  { %1022 = vadd.xlane.f32.xlu0 %v1021_v17 }
  0xe1   :  { %v614_v25 = vpop.f32.mrf.mxu2  ;;  %v669_v26 = vpop.f32.mrf.mxu0 }
  0xe2   :  { %v683_v27 = vpop.f32.mrf.mxu1  ;;  %v615_v32 = vadd.f32 %v614_v25, %v601_v28  ;;  %v628_v55 = vpop.f32.mrf.mxu3  ;;  %v670_v8 = vadd.f32 %v669_v26, %v571_v61 }
  0xe3   :  { %v684_v33 = vadd.f32 %v683_v27, %v627_v62 }
  0xe4   :  { %v629_v34 = vadd.f32 %v628_v55, %v615_v32  ;;  %v694_v38 = vadd.f32 %v690_v9, %v670_v8 }
  0xe5   :  { %v695_v39 = vadd.f32 %v691_v30, %v684_v33 }
  0xe6   :  { %v698_v44 = vmax.f32 %v694_v38, 0.0 }
  0xe7   :  { %v699_v35 = vmax.f32 %v695_v39, 0.0 }
  0xe9   :  { %v671_v36 = vpop.f32.mrf.mxu0 }
  0xea   :  { %v685_v37 = vpop.f32.mrf.mxu1  ;;  %v672_v40 = vadd.f32 %v671_v36, %v573_v3 }
  0xeb   :  { %v686_v41 = vadd.f32 %v685_v37, %v629_v34 }
  0xec   :  { %v696_v42 = vadd.f32 %v690_v9, %v672_v40 }
  0xed   :  { %v697_v43 = vadd.f32 %v691_v30, %v686_v41 }
  0xee   :  { %v700_v45 = vmax.f32 %v696_v42, 0.0 }
  0xef   :  { %v701_v46 = vmax.f32 %v697_v43, 0.0 }
  0xf0   :  { %v702_v47 = vpack.c.bf16 %v700_v45, %v698_v44 }
  0xf1   :  { %v703_v48 = vpack.c.bf16 %v701_v46, %v699_v35  ;;  %v2149_v46 = vld [vmem:[%s2613_s10] ss:$0 sm:$0xff] }
  0xf2   :  { %910 = vmatmul.bf16.vlgmr.msra.gmra.mxu2 %v702_v47  ;;  %938 = vmatmul.bf16.vlgmr.msrb.gmra.mxu0 %v702_v47 }
  0xf3   :  { %924 = vmatmul.bf16.vlgmr.msra.gmra.mxu3 %v703_v48  ;;  %952 = vmatmul.bf16.vlgmr.msrb.gmra.mxu1 %v703_v48 }
 0x102   :  { %1900 = vmatmul.msk.bf16.vlgmr.msrb.gmra.mxu2 %vm973_vm2, %v2012_v49 }
 0x103   :  { %1901 = vmatmul.msk.bf16.vlgmr.msrb.gmra.mxu3 %vm973_vm2, %v2012_v49  ;;  %v99_v49 = vld [vmem:[%s2636_s22] sm:$0xff]  }
 0x104   :  { %v101_v54 = vunpack.c.l.bf16 %v99_v49  ;;  %v102_v0 = vunpack.c.h.bf16 %v99_v49 }
 0x13b   :  { %v1020_v35 = vpop.xlane.xlu0 %1019 }
 0x13c   :  { %v1024_v45 = vmul.f32 0.033333335, %v1020_v35 }
 0x13e   :  { %v1068_v47 = vmul.f32 %v2149_v46, %v1024_v45 }
 0x150   :  { %v1023_v48 = vpop.xlane.xlu0 %1022 }
 0x151   :  { %v1025_v53 = vmul.f32 0.033333335, %v1023_v48 }
 0x153   :  { %v1069_v57 = vmul.f32 %v2149_v46, %v1025_v53 }
 0x16f   :  { %v939_v13 = vpop.f32.mrf.mxu0 }
 0x170   :  { %v953_v19 = vpop.f32.mrf.mxu1  ;;  %v940_v23 = vadd.f32 %v939_v13, %v739_v20 }
 0x172   :  { %v954_v29 = vadd.f32 %v953_v19, %v940_v23 }
 0x174   :  { %v959_v9 = vmax.f32 %v954_v29, 0.0  ;;  %v2129_v29 = vld [vmem:[%s2617_s14] sm:$0xff] }
 0x175   :  { %v911_v7 = vpop.f32.mrf.mxu2 }
 0x176   :  { %v925_v10 = vpop.f32.mrf.mxu3  ;;  %v912_v24 = vadd.f32 %v911_v7, %v738_v21  ;;  %v2157_v7 = vpop.eup %2156 }
 0x177   :  { %v941_v22 = vpop.f32.mrf.mxu0  ;;  %vm1209_vm3 = vweird.f32 %v2157_v7 }
 0x178   :  { %v942_v27 = vadd.f32 %v941_v22, %v739_v20  ;;  %v926_v61 = vadd.f32 %v925_v10, %v912_v24  ;;  %v955_v31 = vpop.f32.mrf.mxu1  ;;  %v1205_v10 = vmul.f32 32.0, %v2157_v7 }
 0x17a   :  { %v956_v62 = vadd.f32 %v955_v31, %v942_v27  ;;  %v958_v33 = vmax.f32 %v926_v61, 0.0  ;;  %v1206_v11 = vsub.f32 1.0, %v1205_v10  ;;  %v2138_v61 = vld [vmem:[%s2619_s16 + $0x38] sm:$0xff] }
 0x17b   :  { %1368 = vmatpush.bf16.msra.mxu3 %v2138_v61  ;;  %v110_v61 = vld [vmem:[%s2638_s24 + $0x8] sm:$0xff] }
 0x17c   :  { %v961_v34 = vmax.f32 %v956_v62, 0.0  ;;  %v1207_v12 = vmul.f32 %v2157_v7, %v1206_v11 }
 0x17d   :  { %v913_v15 = vpop.f32.mrf.mxu2 }
 0x17e   :  { %v927_v16 = vpop.f32.mrf.mxu3  ;;  %v914_v28 = vadd.f32 %v913_v15, %v738_v21  ;;  %v1208_v13 = vadd.f32 %v2157_v7, %v1207_v12 }
 0x180   :  { %v928_v32 = vadd.f32 %v927_v16, %v914_v28  ;;  %v2524_v14 = vsel %vm1209_vm3, %v2157_v7, %v1208_v13 }
 0x182   :  { %v960_v36 = vmax.f32 %v928_v32, 0.0  ;;  %v2137_v32 = vld [vmem:[%s2619_s16 + $0x30] sm:$0xff] }
 0x183   :  { %1369 = vmatpush.bf16.msra.mxu3 %v2137_v32 }
 0x185   :  { %v993_v25 = vpop.f32.mrf.mxu2 }
 0x186   :  { %v1007_v26 = vpop.f32.mrf.mxu3  ;;  %v1012_v55 = vmul.f32 0.033333335, %v993_v25  ;;  %v2130_v25 = vld [vmem:[%s2617_s14 + $0x8] sm:$0xff] }
 0x187   :  { %v1013_v8 = vmul.f32 0.033333335, %v1007_v26  ;;  %1289 = vmatpush.bf16.msra.mxu2 %v2130_v25 }
 0x188   :  { %v1026_v39 = vmul.f32 %v1012_v55, %v958_v33  ;;  %v2136_v33 = vld [vmem:[%s2619_s16 + $0x28] sm:$0xff] }
 0x189   :  { %v1027_v40 = vmul.f32 %v1013_v8, %v959_v9  ;;  %1370 = vmatpush.bf16.msra.mxu3 %v2136_v33 }
 0x18b   :  { %1290 = vmatpush.bf16.msra.mxu2 %v2129_v29 }
 0x18d   :  { %v995_v30 = vpop.f32.mrf.mxu2 }
 0x18e   :  { %v1009_v3 = vpop.f32.mrf.mxu3  ;;  %v1014_v37 = vmul.f32 0.033333335, %v995_v30 }
 0x18f   :  { %v1015_v38 = vmul.f32 0.033333335, %v1009_v3 }
 0x190   :  { %v1028_v41 = vmul.f32 %v1014_v37, %v960_v36 }
 0x191   :  { %v1029_v42 = vmul.f32 %v1015_v38, %v961_v34  ;;  %v2135_v34 = vld [vmem:[%s2619_s16 + $0x20] sm:$0xff] }
 0x192   :  { %v1030_v43 = vpack.c.bf16 %v1028_v41, %v1026_v39  ;;  %1371 = vmatpush.bf16.msra.mxu3 %v2135_v34 }
 0x193   :  { %v1031_v44 = vpack.c.bf16 %v1029_v42, %v1027_v40 }
 0x194   :  { %1174 = vmatmul.bf16.vlgmr.msra.gmra.mxu0 %v1030_v43 }
 0x195   :  { %1188 = vmatmul.bf16.vlgmr.msra.gmra.mxu1 %v1031_v44  ;;  %v2150_v44 = vld [vmem:[%s2615_s12] ss:$0 sm:$0xff] }
 0x211   :  { %v1175_v50 = vpop.f32.mrf.mxu0 }
 0x212   :  { %v1189_v51 = vpop.f32.mrf.mxu1  ;;  %v1176_v52 = vadd.f32 %v1175_v50, %v1068_v47  ;;  %v2151_v47 = vld [vmem:[%s2616_s13] ss:$0 sm:$0xff] }
 0x214   :  { %v1190_v56 = vadd.f32 %v1189_v51, %v1176_v52 }
 0x216   :  { %v1194_v58 = vadd.f32 %v1190_v56, %v101_v54  ;;  %v2134_v54 = vld [vmem:[%s2619_s16 + $0x18] sm:$0xff]  ;;  %v2133_v56 = vld [vmem:[%s2619_s16 + $0x10] sm:$0xff] }
 0x217   :  { %1372 = vmatpush.bf16.msra.mxu3 %v2134_v54 }
 0x218   :  { %v1198_v59 = vsel %vm656_vm0, %v1194_v58, 0.0 }
 0x219   :  { %v1177_v60 = vpop.f32.mrf.mxu0  ;;  %1199 = vadd.xlane.f32.xlu1 %v1198_v59 }
 0x21a   :  { %v1178_v63 = vadd.f32 %v1177_v60, %v1069_v57  ;;  %v1191_v1 = vpop.f32.mrf.mxu1  ;;  %v2132_v57 = vld [vmem:[%s2619_s16 + $0x8] sm:$0xff]  ;;  %v2152_v60 = vld [vmem:[%s2618_s15] ss:$0 sm:$0xff] }
 0x21b   :  { %1373 = vmatpush.bf16.msra.mxu3 %v2133_v56 }
 0x21c   :  { %v1192_v2 = vadd.f32 %v1191_v1, %v1178_v63 }
 0x21e   :  { %v1195_v4 = vadd.f32 %v1192_v2, %v102_v0 }
 0x21f   :  { %1374 = vmatpush.bf16.msra.mxu3 %v2132_v57 }
 0x220   :  { %v1201_v5 = vsel %vm656_vm0, %v1195_v4, 0.0 }
 0x221   :  { %1202 = vadd.xlane.f32.xlu1 %v1201_v5 }
 0x28c   :  { %v1200_v15 = vpop.xlane.xlu1 %1199 }
 0x28d   :  { %v1211_v16 = vmul.f32 %v2524_v14, %v1200_v15 }
 0x28f   :  { %v1213_v17 = vsub.f32 %v1194_v58, %v1211_v16  ;;  %v2131_v58 = vld [vmem:[%s2619_s16] sm:$0xff] }
 0x290   :  { %1375 = vmatpush.bf16.msra.mxu3 %v2131_v58 }
 0x291   :  { %v1215_v18 = vmul.f32 %v1213_v17, %v1213_v17 }
 0x293   :  { %v1217_v19 = vsel %vm656_vm0, %v1215_v18, 0.0  ;;  %v109_v18 = vld [vmem:[%s2638_s24] sm:$0xff] }
 0x294   :  { %1218 = vadd.xlane.f32.xlu2 %v1217_v19  ;;  %v1203_v20 = vpop.xlane.xlu1 %1202  ;;  %v2249_v19 = vmov 0  }
 0x295   :  { %v1212_v21 = vmul.f32 %v2524_v14, %v1203_v20  ;;  %2146 = vset.pattern.permute.xlu1 %v2249_v19  ;;  %2147 = vset.pattern.permute.xlu2 %v2249_v19 }
 0x296   :  { %2148 = vset.pattern.permute.xlu0 %v2249_v19 }
 0x297   :  { %v1214_v22 = vsub.f32 %v1195_v4, %v1212_v21 }
 0x299   :  { %v1216_v23 = vmul.f32 %v1214_v22, %v1214_v22 }
 0x29b   :  { %v1220_v24 = vsel %vm656_vm0, %v1216_v23, 0.0 }
 0x29c   :  { %1221 = vadd.xlane.f32.xlu2 %v1220_v24 }
 0x307   :  { %v1219_v26 = vpop.xlane.xlu2 %1218 }
 0x308   :  { %v1223_v27 = vmul.f32 %v1219_v26, %v2524_v14 }
 0x30a   :  { %v1225_v28 = vadd.f32 1e-06, %v1223_v27 }
 0x30c   :  { %2158 = vrsqrt.f32 %v1225_v28  ;;  %vm1233_vm5 = vweird.f32 %v1225_v28 }
 0x30f   :  { %v1222_v31 = vpop.xlane.xlu2 %1221 }
 0x310   :  { %v1224_v62 = vmul.f32 %v1222_v31, %v2524_v14 }
 0x312   :  { %v2159_v55 = vpop.eup %2158  ;;  %v1226_v8 = vadd.f32 1e-06, %v1224_v62 }
 0x313   :  { %v1228_v9 = vmul.f32 %v2159_v55, %v1225_v28  ;;  %vm1234_vm4 = vweird.f32 %v2159_v55 }
 0x314   :  { %2160 = vrsqrt.f32 %v1226_v8  ;;  %vm1235_vm6 = vmor %vm1233_vm5, %vm1234_vm4  ;;  %vm1243_vm8 = vweird.f32 %v1226_v8 }
 0x315   :  { %v1229_v30 = vmul.f32 %v2159_v55, %v1228_v9 }
 0x317   :  { %v1230_v3 = vmul.f32 0.5, %v1229_v30 }
 0x319   :  { %v1231_v36 = vsub.f32 1.5, %v1230_v3 }
 0x31a   :  { %v2161_v37 = vpop.eup %2160 }
 0x31b   :  { %v1232_v38 = vmul.f32 %v2159_v55, %v1231_v36  ;;  %v1238_v39 = vmul.f32 %v2161_v37, %v1226_v8  ;;  %vm1244_vm7 = vweird.f32 %v2161_v37 }
 0x31c   :  { %vm1245_vm9 = vmor %vm1243_vm8, %vm1244_vm7 }
 0x31d   :  { %v1239_v40 = vmul.f32 %v2161_v37, %v1238_v39  ;;  %v1236_v41 = vsel %vm1235_vm6, %v2159_v55, %v1232_v38 }
 0x31e   :  { %v1247_v35 = vmul.f32 %v1236_v41, %v1213_v17 }
 0x31f   :  { %v1240_v42 = vmul.f32 0.5, %v1239_v40  ;;  %v2154_v40 = vld [vmem:[%s2621_s18] ss:$0 sm:$0xff]  ;;  %s2250_s18 = smov [#allocation7]  }
 0x320   :  { %v1252_v48 = vmul.f32 %v2150_v44, %v1247_v35  ;;  %s1458_s26 = sshll.u32 %s2250_s18, 4  ;;  %s1459_s26 = int_to_ptr.vmem [resolvable:$true] %s1458_s26 }
 0x321   :  { %v1241_v43 = vsub.f32 1.5, %v1240_v42 }
 0x322   :  { %v1257_v51 = vadd.f32 %v2151_v47, %v1252_v48 }
 0x323   :  { %v1242_v45 = vmul.f32 %v2161_v37, %v1241_v43 }
 0x325   :  { %v1246_v46 = vsel %vm1245_vm9, %v2161_v37, %v1242_v45 }
 0x326   :  { %v1248_v49 = vmul.f32 %v1246_v46, %v1214_v22 }
 0x328   :  { %v1253_v50 = vmul.f32 %v2150_v44, %v1248_v49 }
 0x32a   :  { %v1258_v52 = vadd.f32 %v2151_v47, %v1253_v50 }
 0x32c   :  { %v1259_v53 = vpack.c.bf16 %v1258_v52, %v1257_v51 }
 0x32e   :  { %1974 = vmatmul.msk.bf16.vlgmr.msra.gmra.mxu2 %vm656_vm0, %v1259_v53 }
 0x3b1   :  { %v1292_v59 = vpop.f32.mrf.mxu2 }
 0x3b2   :  { %v1293_v63 = vadd.f32 %v2152_v60, %v1292_v59 }
 0x3b4   :  { %v1297_v2 = vmax.f32 %v1293_v63, 0.0 }
 0x3b9   :  { %v1294_v0 = vpop.f32.mrf.mxu2 }
 0x3ba   :  { %v1295_v1 = vadd.f32 %v2152_v60, %v1294_v0 }
 0x3bc   :  { %v1298_v4 = vmax.f32 %v1295_v1, 0.0 }
 0x3be   :  { %v1299_v5 = vpack.c.bf16 %v1298_v4, %v1297_v2 }
 0x3c0   :  { %1376 = vmatmul.bf16.vlgmr.msra.gmra.mxu3 %v1299_v5 }
 0x443   :  { %v1377_v7 = vpop.f32.mrf.mxu3 }
 0x444   :  { %v1378_v10 = vadd.f32 %v2153_v6, %v1377_v7 }
 0x446   :  { %v1382_v11 = vadd.f32 %v1378_v10, %v1257_v51 }
 0x448   :  { %v1386_v12 = vsel %vm656_vm0, %v1382_v11, 0.0 }
 0x449   :  { %1387 = vadd.xlane.f32.xlu0 %v1386_v12 }
 0x44b   :  { %v1379_v13 = vpop.f32.mrf.mxu3 }
 0x44c   :  { %v1380_v15 = vadd.f32 %v2153_v6, %v1379_v13 }
 0x44e   :  { %v1383_v16 = vadd.f32 %v1380_v15, %v1258_v52 }
 0x450   :  { %v1389_v17 = vsel %vm656_vm0, %v1383_v16, 0.0 }
 0x451   :  { %1390 = vadd.xlane.f32.xlu1 %v1389_v17 }
 0x46a   :  { %1442 = vperm.xlu1 %2146, %v109_v18  }
 0x4bc   :  { %v1388_v20 = vpop.xlane.xlu0 %1387 }
 0x4bd   :  { %v1392_v21 = vmul.f32 %v1388_v20, %v2524_v14 }
 0x4bf   :  { %v1394_v22 = vsub.f32 %v1382_v11, %v1392_v21 }
 0x4c1   :  { %v1396_v23 = vmul.f32 %v1394_v22, %v1394_v22 }
 0x4c3   :  { %v1398_v24 = vsel %vm656_vm0, %v1396_v23, 0.0 }
 0x4c4   :  { %v1391_v25 = vpop.xlane.xlu1 %1390  ;;  %1399 = vadd.xlane.f32.xlu2 %v1398_v24 }
 0x4c5   :  { %v1393_v26 = vmul.f32 %v1391_v25, %v2524_v14 }
 0x4c7   :  { %v1395_v27 = vsub.f32 %v1383_v16, %v1393_v26 }
 0x4c9   :  { %v1397_v28 = vmul.f32 %v1395_v27, %v1395_v27 }
 0x4cb   :  { %v1401_v29 = vsel %vm656_vm0, %v1397_v28, 0.0 }
 0x4cc   :  { %1402 = vadd.xlane.f32.xlu0 %v1401_v29 }
 0x4dc   :  { %1447 = vperm.xlu2 %2147, %v110_v61   ;;  %v1443_v46 = vpop.permute.xlu1 %1442 }
 0x537   :  { %v1400_v31 = vpop.xlane.xlu2 %1399 }
 0x538   :  { %v1404_v62 = vmul.f32 %v1400_v31, %v2524_v14 }
 0x53a   :  { %v1406_v32 = vadd.f32 1e-06, %v1404_v62 }
 0x53c   :  { %2162 = vrsqrt.f32 %v1406_v32  ;;  %vm1414_vm11 = vweird.f32 %v1406_v32 }
 0x53f   :  { %v1403_v55 = vpop.xlane.xlu0 %1402  ;;  %v1448_v53 = vpop.permute.xlu2 %1447 }
 0x540   :  { %v1405_v8 = vmul.f32 %v1403_v55, %v2524_v14  ;;  %v2155_v14 = vld [vmem:[%s2622_s19] ss:$0 sm:$0xff] }
 0x542   :  { %v2163_v9 = vpop.eup %2162  ;;  %v1407_v33 = vadd.f32 1e-06, %v1405_v8 }
 0x543   :  { %v1409_v30 = vmul.f32 %v2163_v9, %v1406_v32  ;;  %vm1415_vm10 = vweird.f32 %v2163_v9 }
 0x544   :  { %2164 = vrsqrt.f32 %v1407_v33  ;;  %vm1416_vm12 = vmor %vm1414_vm11, %vm1415_vm10  ;;  %vm1424_vm14 = vweird.f32 %v1407_v33 }
 0x545   :  { %v1410_v3 = vmul.f32 %v2163_v9, %v1409_v30 }
 0x547   :  { %v1411_v34 = vmul.f32 0.5, %v1410_v3 }
 0x549   :  { %v1412_v36 = vsub.f32 1.5, %v1411_v34 }
 0x54a   :  { %v2165_v37 = vpop.eup %2164 }
 0x54b   :  { %v1413_v38 = vmul.f32 %v2163_v9, %v1412_v36  ;;  %v1419_v39 = vmul.f32 %v2165_v37, %v1407_v33  ;;  %vm1425_vm13 = vweird.f32 %v2165_v37 }
 0x54c   :  { %vm1426_vm15 = vmor %vm1424_vm14, %vm1425_vm13 }
 0x54d   :  { %v1420_v41 = vmul.f32 %v2165_v37, %v1419_v39  ;;  %v1417_v42 = vsel %vm1416_vm12, %v2163_v9, %v1413_v38 }
 0x54e   :  { %v1428_v43 = vmul.f32 %v1417_v42, %v1394_v22 }
 0x54f   :  { %v1421_v44 = vmul.f32 0.5, %v1420_v41 }
 0x550   :  { %v1433_v35 = vmul.f32 %v2154_v40, %v1428_v43 }
 0x551   :  { %v1422_v45 = vsub.f32 1.5, %v1421_v44 }
 0x552   :  { %v1438_v47 = vadd.f32 %v2155_v14, %v1433_v35 }
 0x553   :  { %v1423_v48 = vmul.f32 %v2165_v37, %v1422_v45 }
 0x554   :  { %v1450_v49 = vmul.f32 %v1443_v46, %v1438_v47 }
 0x555   :  { %v1427_v50 = vsel %vm1426_vm15, %v2165_v37, %v1423_v48 }
 0x556   :  { %1452 = vst.msk [vmem:[#allocation7] sm:$0xff] %vm656_vm0, %v1450_v49  ;;  %v1429_v51 = vmul.f32 %v1427_v50, %v1395_v27 }
 0x558   :  { %v1434_v52 = vmul.f32 %v2154_v40, %v1429_v51 }
 0x55a   :  { %v1439_v54 = vadd.f32 %v2155_v14, %v1434_v52 }
 0x55c   :  { %v1451_v56 = vmul.f32 %v1448_v53, %v1439_v54 }
 0x55e   :  { %1453 = vst.msk [vmem:[#allocation7 + $0x8] sm:$0xff] %vm656_vm0, %v1451_v56 }
 0x55f   :  { %1466 = dma.vmem_to_hbm [thread:$0]  %s1459_s26, 256, %s1461_s29, [#allocation4], %s2245_s27, %s2245_s27, %s2246_s28  }
 0x560   :  { %2242 = dma.done.wait [#allocation4], 256  }
 0x561   :  { %2243 = vsyncadd [#allocation4], 4294967040 }
 0x562   :  { %1471 = vsyncpa [#allocation3], 1 }
 0x563   :  { %1472 = vsyncpa [#allocation6], 1 }
 0x564   :  { %1473 = vsyncpa [#allocation4], 1 }

</bundles_post_ra>
